<compile_context>
chip_gen: v6e
topology: v6e:2x2x1
jax: 0.10.0
libtpu: 0.0.40
codegen_flags: <defaults>
</compile_context>

<pallas_src>
import functools
import math

import jax
import jax.numpy as jnp
from jax import lax
from jax.experimental import pallas as pl
from jax.experimental.pallas import tpu as pltpu

HIDDEN = 512   # Conv1 out channels
OUT_CH = 2     # Conv2 out channels
MIB = 1024 * 1024


# ----------------------------------------------------------------------------
# Gradient-reversal layer: identity in forward, -0.1 * g in backward
# (matches GRLayer with ctx.alpha = 0.1).
@jax.custom_vjp
def grad_reverse(x):
    return x


def _gr_fwd(x):
    return x, None


def _gr_bwd(_, g):
    return (-0.1 * g,)


grad_reverse.defvjp(_gr_fwd, _gr_bwd)


# ----------------------------------------------------------------------------
# Small helpers (all trace-time Python).
def _round_up(x, m):
    return ((x + m - 1) // m) * m


def _chunk_for(t):
    """Lane-chunk size used inside the kernel; always divides t."""
    if t % 256 == 0:
        return 256
    if t % 128 == 0:
        return 128
    return t


def _tpu_vmem_capacity_bytes():
    """Physical VMEM per core; conservative 64 MiB fallback (always safe)."""
    try:
        info = pltpu.get_tpu_info()
        for name in ("vmem_capacity_bytes", "vmem_bytes", "vmem_size_bytes"):
            cap = getattr(info, name, None)
            if cap:
                return int(cap)
    except Exception:
        pass
    return 64 * MIB


def _vmem_tile_bytes(c, t, x_itemsize, x_bufs, w_bufs):
    """Rough VMEM footprint for one grid step with the given buffering."""
    chunk = _chunk_for(t)
    x_tile = c * t * x_itemsize                              # streamed activation tile
    out_tile = OUT_CH * t * 4                                # f32 output tile
    weights = (HIDDEN * c + OUT_CH * HIDDEN) * x_itemsize + (HIDDEN + OUT_CH) * 4
    hidden = HIDDEN * chunk * 4                              # chunked f32 intermediate
    return x_bufs * x_tile + 2 * out_tile + w_bufs * weights + hidden


def _choose_tile(hw, c, n, requested, budget, num_tc, x_itemsize, x_bufs, w_bufs):
    def fits(t):
        return _vmem_tile_bytes(c, t, x_itemsize, x_bufs, w_bufs) <= budget

    if hw <= requested:
        t = hw
        # v7x: if the total grid would be odd across 2 TCs, split each image.
        if num_tc > 1 and (n % num_tc) != 0 and hw >= num_tc * 256:
            t = _round_up(-(-hw // num_tc), 128)
        # Guard (review): with very large C even a single tile can blow the
        # budget and the 256-aligned shrink would never fire; use a
        # 128-aligned fallback shrink instead.
        while not fits(t) and t > 128:
            nt = max(128, ((t // 2) // 128) * 128)
            if nt == t:
                break
            t = nt
        return t

    t = requested
    while not fits(t) and t > 128 and t % 128 == 0:
        t //= 2
    if num_tc > 1:
        tiles = -(-hw // t)
        add = 0
        while ((n * (tiles + add)) % num_tc) != 0:
            add += 1
        if add:
            tiles += add
            t_bal = _round_up(-(-hw // tiles), 128)
            if (n * (-(-hw // t_bal))) % num_tc == 0:
                t = t_bal
    return t


# ----------------------------------------------------------------------------
# Feature probe: BlockSpec(pipeline_mode=pl.Buffered(k)) support on this build.
_BUFFERED_OK = {}


def _probe_buffered(count):
    if count in _BUFFERED_OK:
        return _BUFFERED_OK[count]
    ok = False
    try:
        def _copy(x_ref, o_ref):
            o_ref[...] = x_ref[...]

        f = pl.pallas_call(
            _copy,
            out_shape=jax.ShapeDtypeStruct((8, 512), jnp.float32),
            grid=(4,),
            in_specs=[pl.BlockSpec((8, 128), lambda i: (0, i),
                                   pipeline_mode=pl.Buffered(count))],
            out_specs=pl.BlockSpec((8, 128), lambda i: (0, i)),
        )
        jax.block_until_ready(f(jnp.zeros((8, 512), jnp.float32)))
        ok = True
    except Exception:
        ok = False
    _BUFFERED_OK[count] = ok
    return ok


def _spec(shape, index_map, buffers):
    if buffers is None:
        return pl.BlockSpec(shape, index_map)
    return pl.BlockSpec(shape, index_map, pipeline_mode=pl.Buffered(buffers))


# ----------------------------------------------------------------------------
# Pallas kernel: per-pixel 2-layer MLP (1x1 conv -> ReLU -> 1x1 conv), computed
# channel-major so HW sits in the lane dimension (lane-dense unmasked stores).
def _image_da_kernel(x_ref, w1_ref, b1_ref, w2_ref, b2_ref, o_ref, *, chunk):
    # x_ref:  (1, C, T)  bf16        w1_ref: (512, C) bf16   b1_ref: (512, 1) f32
    # w2_ref: (2, 512)   bf16        b2_ref: (2, 1)   f32
    # o_ref:  (1, 2, T)  f32
    w1 = w1_ref[...]
    w2 = w2_ref[...]
    b1 = b1_ref[...]
    b2 = b2_ref[...]
    t = o_ref.shape[-1]
    n_chunks = t // chunk          # chunk always divides t by construction

    def body(ci, carry):
        off = ci * chunk
        if not isinstance(off, int):
            off = pl.multiple_of(off, chunk)
        xc = x_ref[0, :, pl.ds(off, chunk)]                                # (C, chunk)
        h = jnp.dot(w1, xc, preferred_element_type=jnp.float32)           # (512, chunk) f32
        h = jnp.maximum(h + b1, 0.0)                                       # bias + ReLU (f32)
        oc = jnp.dot(w2, h.astype(w2.dtype),
                     preferred_element_type=jnp.float32) + b2              # (2, chunk) f32
        o_ref[0, :, pl.ds(off, chunk)] = oc.astype(o_ref.dtype)
        return carry

    if n_chunks == 1:
        body(0, 0)
    else:
        lax.fori_loop(0, n_chunks, body, 0, unroll=True)


# ----------------------------------------------------------------------------
@functools.partial(jax.jit,
                   static_argnames=("t_hw", "compute_dtype", "x_buffers", "w_buffers"))
def _forward_impl(x_nchw, need_backprop, w1, b1, w2, b2,
                  *, t_hw, compute_dtype, x_buffers, w_buffers):
    x_nchw = grad_reverse(x_nchw)

    n, c, h, w = x_nchw.shape
    hw = h * w
    x_itemsize = jnp.dtype(compute_dtype).itemsize
    x_bufs = x_buffers if x_buffers is not None else 2
    w_bufs = w_buffers if w_buffers is not None else 2

    # --- generation-aware budgets (trace-time Python) -----------------------
    cap = _tpu_vmem_capacity_bytes()
    small_vmem = cap < 96 * MIB            # v7x-class part: 64 MiB/TC, 2 TensorCores
    num_tc = 2 if small_vmem else 1
    vmem_budget = 40 * MIB if small_vmem else 100 * MIB
    vmem_cap = 48 * MIB if small_vmem else 112 * MIB

    if t_hw is None:
        t_hw = 1024 if small_vmem else 2048

    t_hw = _choose_tile(hw, c, n, t_hw, vmem_budget, num_tc,
                        x_itemsize, x_bufs, w_bufs)
    chunk = _chunk_for(t_hw)

    footprint = _vmem_tile_bytes(c, t_hw, x_itemsize, x_bufs, w_bufs)
    vmem_limit = int(min(max(2 * footprint, 32 * MIB), vmem_cap))

    # --- free reshapes + bf16 casts of the dominant HBM streams -------------
    x3 = x_nchw.reshape(n, c, hw).astype(compute_dtype)    # (N, C, HW)
    w1c = w1.astype(compute_dtype)                         # (512, C)  PyTorch layout
    w2c = w2.astype(compute_dtype)                         # (2, 512)
    b1c = b1.astype(jnp.float32).reshape(HIDDEN, 1)
    b2c = b2.astype(jnp.float32).reshape(OUT_CH, 1)

    grid = (n, pl.cdiv(hw, t_hw))
    kernel = functools.partial(_image_da_kernel, chunk=chunk)

    out3 = pl.pallas_call(
        kernel,
        out_shape=jax.ShapeDtypeStruct((n, OUT_CH, hw), jnp.float32),
        grid_spec=pltpu.PrefetchScalarGridSpec(
            num_scalar_prefetch=0,
            grid=grid,
            in_specs=[
                # streamed activation tile: deeper buffering hides HBM latency
                _spec((1, c, t_hw), lambda i, j: (i, 0, j), x_buffers),
                # grid-invariant weights/biases: single-buffered (never re-DMA'd)
                _spec((HIDDEN, c), lambda i, j: (0, 0), w_buffers),
                _spec((HIDDEN, 1), lambda i, j: (0, 0), w_buffers),
                _spec((OUT_CH, HIDDEN), lambda i, j: (0, 0), w_buffers),
                _spec((OUT_CH, 1), lambda i, j: (0, 0), w_buffers),
            ],
            out_specs=pl.BlockSpec((1, OUT_CH, t_hw), lambda i, j: (i, 0, j)),
        ),
        compiler_params=pltpu.CompilerParams(
            dimension_semantics=("parallel", "parallel"),
            vmem_limit_bytes=vmem_limit,
        ),
    )(x3, w1c, b1c, w2c, b2c)

    # (N, 2, HW) -> (N, 2, H, W): free reshape, already NCHW.
    feat_nchw = out3.reshape(n, OUT_CH, h, w)

    # ImageLabelResizeLayer: nearest-resizing a per-image scalar label to (H, W)
    # is a constant fill. int32 here (PyTorch uses int64).
    # TODO(synk): could be fused as a second int32 pallas output via scalar
    # prefetch of need_backprop; kept as a tiny XLA broadcast for simplicity.
    label = jnp.broadcast_to(
        need_backprop.astype(jnp.int32).reshape(n, 1, 1), (n, h, w)
    )
    return feat_nchw, label


def image_da_grl_forward(x_nchw, need_backprop, w1, b1, w2, b2,
                         *, t_hw=None, compute_dtype=jnp.bfloat16):
    """Forward pass of _ImageDA_grl.

    Args:
      x_nchw:        (N, C, H, W) float32 feature map (PyTorch NCHW layout).
      need_backprop: (N,) per-image domain label.
      w1, b1:        Conv1 weights (HIDDEN, C) and bias (HIDDEN,)   [PyTorch layout].
      w2, b2:        Conv2 weights (OUT_CH, HIDDEN) and bias (OUT_CH,).

    Returns:
      feat_nchw: (N, OUT_CH, H, W) float32
      label:     (N, H, W) int32
    """
    # Feature-probe BlockSpec pipeline_mode support OUTSIDE the jit trace.
    x_buffers = 3 if _probe_buffered(3) else None
    w_buffers = 1 if _probe_buffered(1) else None
    return _forward_impl(x_nchw, need_backprop, w1, b1, w2, b2,
                         t_hw=t_hw, compute_dtype=compute_dtype,
                         x_buffers=x_buffers, w_buffers=w_buffers)


# ----------------------------------------------------------------------------
# Pure-JAX f32 reference for correctness checking.
def reference_forward(x_nchw, need_backprop, w1, b1, w2, b2):
    n, c, h, w = x_nchw.shape
    hid = jnp.einsum("oc,nchw->nohw", w1, x_nchw) + b1[None, :, None, None]
    hid = jnp.maximum(hid, 0.0)
    out = jnp.einsum("oc,nchw->nohw", w2, hid) + b2[None, :, None, None]
    label = jnp.broadcast_to(
        need_backprop.astype(jnp.int32).reshape(n, 1, 1), (n, h, w)
    )
    return out, label


if __name__ == "__main__":
    key = jax.random.PRNGKey(0)
    k_x, k_w1, k_b1, k_w2, k_b2 = jax.random.split(key, 5)

    N, C, H, W = 2, 4, 16, 16  # dim = 4

    x = jax.random.normal(k_x, (N, C, H, W), dtype=jnp.float32)
    need_backprop = jnp.array([1.0, 0.0], dtype=jnp.float32)  # (N,)

    # PyTorch Conv2d 1x1 weight layout: (out_channels, in_channels).
    w1 = jax.random.normal(k_w1, (HIDDEN, C), dtype=jnp.float32) * 0.05
    b1 = jax.random.normal(k_b1, (HIDDEN,), dtype=jnp.float32) * 0.01
    w2 = jax.random.normal(k_w2, (OUT_CH, HIDDEN), dtype=jnp.float32) * 0.05
    b2 = jax.random.normal(k_b2, (OUT_CH,), dtype=jnp.float32) * 0.01

    feat, label = image_da_grl_forward(x, need_backprop, w1, b1, w2, b2)
    feat = jax.block_until_ready(feat)
    label = jax.block_until_ready(label)

    ref_feat, ref_label = reference_forward(x, need_backprop, w1, b1, w2, b2)

    assert feat.shape == (N, OUT_CH, H, W), feat.shape
    assert label.shape == (N, H, W), label.shape

    # bf16 activation/weight streams vs f32 reference -> tolerance-based check.
    abs_err = float(jnp.max(jnp.abs(feat - ref_feat)))
    scale = float(jnp.max(jnp.abs(ref_feat))) + 1e-6
    assert abs_err / scale < 3e-2, (abs_err, scale)
    assert jnp.array_equal(label, ref_label)

    print("KERNEL_OK")
</pallas_src>

<mosaic_0001>
module attributes {stable_mosaic.version = 11 : i64} {
  func.func @_copy(%arg0: i32, %arg1: memref<8x128xf32, #tpu.memory_space<vmem>>, %arg2: memref<8x128xf32, #tpu.memory_space<vmem>>) attributes {dimension_semantics = [#tpu.dimension_semantics<arbitrary>], iteration_bounds = array<i64: 4>, scalar_prefetch = 0 : i64, scratch_operands = 0 : i64, tpu.core_type = #tpu.core_type<tc>, window_params = [{pipeline_mode = #tpu.pipeline_mode<synchronous>, transform_indices = @transform_0, window_bounds = array<i64: 8, 128>}, {transform_indices = @transform_1, window_bounds = array<i64: 8, 128>}]} {
    %c0 = arith.constant 0 : index
    %c0_0 = arith.constant 0 : index
    %0 = vector.load %arg1[%c0, %c0_0] : memref<8x128xf32, #tpu.memory_space<vmem>>, vector<8x128xf32>
    %c0_1 = arith.constant 0 : index
    %c0_2 = arith.constant 0 : index
    %1 = vector.load %arg2[%c0_1, %c0_2] : memref<8x128xf32, #tpu.memory_space<vmem>>, vector<8x128xf32>
    tpu.vector_store %arg2[%c0_1, %c0_2], %0 {strides = array<i32>} : memref<8x128xf32, #tpu.memory_space<vmem>>, vector<8x128xf32>,
    return
  }
  func.func @transform_0(%arg0: i32) -> (i32, i32) {
    %c0_i32 = arith.constant 0 : i32
    %c0_i32_0 = arith.constant 0 : i32
    return %c0_i32, %arg0 : i32, i32
  }
  func.func @transform_1(%arg0: i32) -> (i32, i32) {
    %c0_i32 = arith.constant 0 : i32
    %c0_i32_0 = arith.constant 0 : i32
    return %c0_i32, %arg0 : i32, i32
  }
}

module attributes {stable_mosaic.version = 11 : i64} {
  func.func @_image_da_kernel(%arg0: i32, %arg1: i32, %arg2: memref<1x4x256xbf16, #tpu.memory_space<vmem>>, %arg3: memref<512x4xbf16, #tpu.memory_space<vmem>>, %arg4: memref<512x1xf32, #tpu.memory_space<vmem>>, %arg5: memref<2x512xbf16, #tpu.memory_space<vmem>>, %arg6: memref<2x1xf32, #tpu.memory_space<vmem>>, %arg7: memref<1x2x256xf32, #tpu.memory_space<vmem>>) attributes {dimension_semantics = [#tpu.dimension_semantics<parallel>, #tpu.dimension_semantics<parallel>], iteration_bounds = array<i64: 2, 1>, scalar_prefetch = 0 : i64, scratch_operands = 0 : i64, tpu.core_type = #tpu.core_type<tc>, window_params = [{transform_indices = @transform_0, window_bounds = array<i64: 1, 4, 256>}, {pipeline_mode = #tpu.pipeline_mode<synchronous>, transform_indices = @transform_1, window_bounds = array<i64: 512, 4>}, {pipeline_mode = #tpu.pipeline_mode<synchronous>, transform_indices = @transform_2, window_bounds = array<i64: 512, 1>}, {pipeline_mode = #tpu.pipeline_mode<synchronous>, transform_indices = @transform_3, window_bounds = array<i64: 2, 512>}, {pipeline_mode = #tpu.pipeline_mode<synchronous>, transform_indices = @transform_4, window_bounds = array<i64: 2, 1>}, {transform_indices = @transform_5, window_bounds = array<i64: 1, 2, 256>}]} {
    %c0 = arith.constant 0 : index
    %c0_0 = arith.constant 0 : index
    %0 = vector.load %arg3[%c0, %c0_0] : memref<512x4xbf16, #tpu.memory_space<vmem>>, vector<512x4xbf16>
    %c0_1 = arith.constant 0 : index
    %c0_2 = arith.constant 0 : index
    %1 = vector.load %arg5[%c0_1, %c0_2] : memref<2x512xbf16, #tpu.memory_space<vmem>>, vector<2x512xbf16>
    %c0_3 = arith.constant 0 : index
    %c0_4 = arith.constant 0 : index
    %2 = vector.load %arg4[%c0_3, %c0_4] : memref<512x1xf32, #tpu.memory_space<vmem>>, vector<512x1xf32>
    %c0_5 = arith.constant 0 : index
    %c0_6 = arith.constant 0 : index
    %3 = vector.load %arg6[%c0_5, %c0_6] : memref<2x1xf32, #tpu.memory_space<vmem>>, vector<2x1xf32>
    %c0_7 = arith.constant 0 : index
    %c0_8 = arith.constant 0 : index
    %c0_9 = arith.constant 0 : index
    %4 = vector.load %arg2[%c0_7, %c0_8, %c0_9] : memref<1x4x256xbf16, #tpu.memory_space<vmem>>, vector<1x4x256xbf16>
    %5 = vector.shape_cast %4 : vector<1x4x256xbf16> to vector<4x256xbf16>
    %cst = arith.constant dense<0.000000e+00> : vector<512x256xf32>
    %6 = tpu.matmul %0, %5, %cst {dimension_numbers = #tpu.dot_dimension_numbers<[1], [0], [0], [1], [0, 0, 1, 1], [], []>} : vector<512x4xbf16>, vector<4x256xbf16>, vector<512x256xf32> -> vector<512x256xf32>
    %7 = vector.broadcast %2 : vector<512x1xf32> to vector<512x256xf32>
    %8 = arith.addf %6, %7 : vector<512x256xf32>
    %cst_10 = arith.constant 0.000000e+00 : f32
    %9 = vector.broadcast %cst_10 : f32 to vector<512x256xf32>
    %10 = arith.maximumf %8, %9 : vector<512x256xf32>
    %11 = arith.truncf %10 : vector<512x256xf32> to vector<512x256xbf16>
    %cst_11 = arith.constant dense<0.000000e+00> : vector<2x256xf32>
    %12 = tpu.matmul %1, %11, %cst_11 {dimension_numbers = #tpu.dot_dimension_numbers<[1], [0], [0], [1], [0, 0, 1, 1], [], []>} : vector<2x512xbf16>, vector<512x256xbf16>, vector<2x256xf32> -> vector<2x256xf32>
    %13 = vector.broadcast %3 : vector<2x1xf32> to vector<2x256xf32>
    %14 = arith.addf %12, %13 : vector<2x256xf32>
    %c0_12 = arith.constant 0 : index
    %c0_13 = arith.constant 0 : index
    %c0_14 = arith.constant 0 : index
    %15 = vector.load %arg7[%c0_12, %c0_13, %c0_14] : memref<1x2x256xf32, #tpu.memory_space<vmem>>, vector<1x2x256xf32>
    %16 = vector.shape_cast %15 : vector<1x2x256xf32> to vector<2x256xf32>
    %17 = vector.shape_cast %14 : vector<2x256xf32> to vector<1x2x256xf32>
    tpu.vector_store %arg7[%c0_12, %c0_13, %c0_14], %17 {strides = array<i32>} : memref<1x2x256xf32, #tpu.memory_space<vmem>>, vector<1x2x256xf32>,
    return
  }
  func.func @transform_0(%arg0: i32, %arg1: i32) -> (i32, i32, i32) {
    %c0_i32 = arith.constant 0 : i32
    %c0_i32_0 = arith.constant 0 : i32
    return %arg0, %c0_i32, %arg1 : i32, i32, i32
  }
  func.func @transform_1(%arg0: i32, %arg1: i32) -> (i32, i32) {
    %c0_i32 = arith.constant 0 : i32
    %c0_i32_0 = arith.constant 0 : i32
    %c0_i32_1 = arith.constant 0 : i32
    return %c0_i32, %c0_i32_0 : i32, i32
  }
  func.func @transform_2(%arg0: i32, %arg1: i32) -> (i32, i32) {
    %c0_i32 = arith.constant 0 : i32
    %c0_i32_0 = arith.constant 0 : i32
    %c0_i32_1 = arith.constant 0 : i32
    return %c0_i32, %c0_i32_0 : i32, i32
  }
  func.func @transform_3(%arg0: i32, %arg1: i32) -> (i32, i32) {
    %c0_i32 = arith.constant 0 : i32
    %c0_i32_0 = arith.constant 0 : i32
    %c0_i32_1 = arith.constant 0 : i32
    return %c0_i32, %c0_i32_0 : i32, i32
  }
  func.func @transform_4(%arg0: i32, %arg1: i32) -> (i32, i32) {
    %c0_i32 = arith.constant 0 : i32
    %c0_i32_0 = arith.constant 0 : i32
    %c0_i32_1 = arith.constant 0 : i32
    return %c0_i32, %c0_i32_0 : i32, i32
  }
  func.func @transform_5(%arg0: i32, %arg1: i32) -> (i32, i32, i32) {
    %c0_i32 = arith.constant 0 : i32
    %c0_i32_0 = arith.constant 0 : i32
    return %arg0, %c0_i32, %arg1 : i32, i32, i32
  }
}

</mosaic_0001>

<bundles_post_ra>
// kernel: tpu_custom_call.1
= control target key start
LH: loop header
LB: loop body
LE: loop exit
PB: predicated region body
PF: predicated region fallthrough
CT: control target
= control target key end

     0   :  { %6 = vsyncpa [#allocation3], 0  ;;  %s481_s0 = inlined_call_operand.hbm [shape: f32[8,512], index: 0, kind: input, shape index: {}]   ;;  %s482_s1 = inlined_call_operand.hbm [shape: f32[8,512], index: 1, kind: output, shape index: {}]  }
   0x1   :  { %7 = vsyncpa [#allocation4], 0 }
   0x2   :  { %9 = vsyncpa [#allocation4 + $0x1], 0  ;;  %s353_s6 = smov 0   ;;  %s355_s7 = smov 0  }
   0x3   :  { %s357_s8 = smov 0   ;;  %s359_s9 = smov 0  }
   0x4 LB: > { %s374_s10 = sadd.s32 4294967295, %s339_s9   ;;  %s192_s11 = sadd.s32 4294967294, %s339_s9   ;;  %s339_s9 = sphi %s359_s9, %s499_s9   ;;  %s335_s8 = sphi %s357_s8, %s498_s8   ;;  %s331_s7 = sphi %s355_s7, %s497_s7   ;;  %s327_s6 = sphi %s353_s6, %s496_s6  }
   0x5   : > { %s378_s12 = sadd.s32 1, %s339_s9   ;;  %s22_s13 = sadd.s32 1, %s335_s8 }
   0x6   : > { %s19_s14 = ssub.s32 %s339_s9, %s378_s12  ;;  %p35_p0 = scmp.ne.s32.totalorder %s331_s7, %s327_s6 }
   0x7   : > { %p20_p1 = scmp.eq.s32.totalorder %s19_s14, 0  ;;  %p36_p2 = scmp.eq.s32.totalorder %s374_s10, 0 }
   0x8   : > { %p58_p3 = scmp.ne.s32.totalorder %s335_s8, %s331_s7  ;;  %p59_p4 = scmp.eq.s32.totalorder %s374_s10, 3 }
   0x9   : > { %s390_s15 = scalar_select %p20_p1, %s335_s8, %s22_s13  }
   0xa   : > { %p392_p5 = por %p59_p4, %p58_p3  ;;  %p65_p6 = scmp.eq.s32.totalorder %s192_s11, 3 }
   0xb   : > { %p193_p7 = scmp.ge.s32.totalorder %s339_s9, 1  ;;  %p397_p8 = por %p36_p2, %p35_p0 }
   0xc   : > { %s487_s16 = scalar_select %p392_p5, 1, 0 }
   0xd   : > { %s488_s17 = scalar_select %p397_p8, 1, 0 }
   0xe   : > { %p72_p9 = scmp.lt.s32.totalorder %s339_s9, 5  ;;  %p402_p10 = por %p65_p6, %p35_p0 }
   0xf   : > { %s194_s19 = sshll.u32 %s374_s10, 7  ;;  %s341_s21 = smov [#allocation2]  }
  0x10   : > { %s489_s18 = scalar_select %p402_p10, 1, 0 }
  0x11   : > { %p407_p11 = pnand %p193_p7, %p72_p9  ;;  %s87_s22 = sshll.u32 %s341_s21, 4  ;;  %s88_s22 = int_to_ptr.vmem [resolvable:$true] %s87_s22 }
  0x12   : > { %s85_s25 = scalar_lea.hbm %s481_s0, %s194_s19  ;;  %s252_s30 = scalar_lea.hbm %s481_s0, 512 }
  0x13   : > { %s490_s20 = scalar_select %p407_p11, 1, 0 }
  0x14   : > { %p205_p12 = pneg %p407_p11  ;;  %s247_s27 = scalar_lea.hbm %s85_s25, 128 }
  0x15   : > { %p248_p0 = scmp.ne.s32.totalorder %s85_s25, %s247_s27  ;;  %p253_p4 = scmp.lt.s32.totalorder %s85_s25, %s481_s0 }
  0x16   : > { %p420_p13 = pnand %p205_p12, %p397_p8  ;;  %p254_p6 = scmp.lt.s32.totalorder %s252_s30, %s247_s27 }
  0x18   : > { %p249_p1 = pneg %p420_p13  ;;  %p255_p7 = por %p254_p6, %p253_p4 }
  0x1a   : > { %p250_p2 = pnand %p249_p1, %p248_p0 }
  0x1c   : > { %p251_p3 = pneg %p250_p2 }
  0x1e   : > { %p256_p9 = pnand %p255_p7, %p251_p3 }
  0x20   : > { %259 = shalt.err (!%p256_p9)
}
  0x21   : > { %s260_s4 = scalar_lea.vmem %s88_s22, 128  ;;  %p268_p8 = scmp.lt.s32.totalorder %s88_s22, %s88_s22 }
  0x22   : > { %p261_p12 = scmp.ne.s32.totalorder %s88_s22, %s260_s4  ;;  %p269_p11 = scmp.lt.s32.totalorder %s260_s4, %s260_s4 }
  0x24   : > { %p263_p10 = pnand %p261_p12, %p249_p1  ;;  %p270_p0 = por %p269_p11, %p268_p8 }
  0x26   : > { %p264_p5 = pneg %p263_p10 }
  0x28   : > { %p271_p2 = pnand %p270_p0, %p264_p5 }
  0x2a   : > { %274 = shalt.err (!%p271_p2)
}
  0x2b   : > { %208 = dma.hbm_to_vmem [thread:$0]  (!%p420_p13), %s85_s25, 128, %s88_s22, [#allocation3]  }
  0x2c   : > { %p492_p4 = scmp.ne.s32.totalorder %s490_s20, 0 }
  0x2d   : > { %p493_p6 = scmp.ne.s32.totalorder (!%p492_p4), %s488_s17, 0 }
  0x2e   : > { %100 = sbr.rel (%p492_p4) target bundleno = 77 (0x4d), region = 24 }
  0x33   : > { %318 = dma.done.wait (%p493_p6), [#allocation3], 128  }
  0x34   : > { %320 = vsyncadd (%p493_p6), [#allocation3], 4294967168  ;;  %s112_s5 = sand.u32 1, %s331_s7   ;;  %s446_s22 = scalar_lea.hbm %s482_s1, %s194_s19  ;;  %v115_v0 = vld [vmem:[#allocation2] sm:$0xff] }
  0x35   : > { %s196_s11 = sshll.u32 %s112_s5, 3  ;;  %s118_s20 = scalar_lea.sflag [#allocation4], %s112_s5 }
  0x36   : > { %s114_s13 = scalar_lea.vmem [#allocation5], %s196_s11  ;;  %p494_p8 = scmp.ne.s32.totalorder %s487_s16, 0 }
  0x37   : > { %s131_s14 = sshll.u32 %s114_s13, 4  ;;  %116 = vst [vmem:[%s114_s13] sm:$0xff] %v115_v0  ;;  %s342_s17 = smov [#allocation5]   ;;  %s132_s14 = int_to_ptr.vmem [resolvable:$true] %s131_s14 }
  0x38   : > { %s275_s24 = scalar_lea.vmem %s132_s14, 128  ;;  %s279_s25 = sshll.u32 %s342_s17, 4  ;;  %s280_s25 = int_to_ptr.vmem [resolvable:$false] %s279_s25 }
  0x39   : > { %p276_p5 = scmp.ne.s32.totalorder %s132_s14, %s275_s24  ;;  %s281_s26 = scalar_lea.vmem %s280_s25, 256 }
  0x3a   : > { %p282_p13 = scmp.lt.s32.totalorder %s132_s14, %s280_s25  ;;  %p283_p1 = scmp.lt.s32.totalorder %s281_s26, %s275_s24 }
  0x3b   : > { %p277_p10 = pnand %p276_p5, %p494_p8 }
  0x3c   : > { %p284_p3 = por %p283_p1, %p282_p13 }
  0x3d   : > { %p278_p11 = pneg %p277_p10 }
  0x3f   : > { %p285_p7 = pnand %p284_p3, %p278_p11 }
  0x41   : > { %288 = shalt.err (!%p285_p7)
}
  0x42   : > { %s289_s10 = scalar_lea.hbm %s446_s22, 128  ;;  %s293_s28 = scalar_lea.hbm %s482_s1, 512 }
  0x43   : > { %p290_p9 = scmp.ne.s32.totalorder %s446_s22, %s289_s10  ;;  %p294_p2 = scmp.lt.s32.totalorder %s446_s22, %s482_s1 }
  0x44   : > { %p295_p4 = scmp.lt.s32.totalorder %s293_s28, %s289_s10 }
  0x45   : > { %p291_p12 = pnand %p290_p9, %p494_p8 }
  0x46   : > { %p296_p6 = por %p295_p4, %p294_p2 }
  0x47   : > { %p292_p0 = pneg %p291_p12 }
  0x49   : > { %p297_p5 = pnand %p296_p6, %p292_p0 }
  0x4b   : > { %300 = shalt.err (!%p297_p5)
}
  0x4c   : > { %203 = dma.vmem_to_hbm [thread:$0]  (%p494_p8), %s132_s14, 128, %s446_s22, %s118_s20  }
  0x4d PF: > { %p213_p10 = scmp.ge.s32.totalorder %s339_s9, 2  ;;  %s143_s2 = sand.u32 1, %s327_s6  }
  0x4e   : > { %p495_p11 = scmp.ne.s32.totalorder %s489_s18, 0  ;;  %s144_s3 = scalar_lea.sflag [#allocation4], %s143_s2 }
  0x50   : > { %p210_p13 = pnand %p213_p10, %p495_p11 }
  0x52   : > { %p211_p1 = pneg %p210_p13 }
  0x54   : > { %322 = dma.done.wait (%p211_p1), %s144_s3, 128  }
  0x55   : > { %324 = vsyncadd (%p211_p1), %s144_s3, 4294967168  ;;  %p12_p3 = scmp.ge.s32.totalorder %s378_s12, 6   ;;  %s496_s6 = smov %s331_s7 }
  0x56   : > { %s497_s7 = smov %s335_s8  ;;  %s498_s8 = smov %s390_s15 }
  0x57   : > { %s499_s9 = smov %s378_s12  ;;  %14 = sbr.rel (!%p12_p3) target bundleno = 4 (0x4), region = 62 }
  0x5c   :  { %149 = vsyncpa [#allocation3], 1 }
  0x5d   :  { %151 = vsyncpa [#allocation3 + $0x1], 1 }
  0x5e   :  { %152 = vsyncpa [#allocation4], 1 }
  0x5f   :  { %154 = vsyncpa [#allocation4 + $0x1], 1 }

// kernel: _forward_impl.1
= control target key start
LH: loop header
LB: loop body
LE: loop exit
PB: predicated region body
PF: predicated region fallthrough
CT: control target
= control target key end

     0   :  { %s1948_s18 = smov 0   ;;  %s1950_s19 = smov 0   ;;  %s2830_s0 = inlined_call_operand.vmem [shape: bf16[2,4,256], index: 0, kind: input, shape index: {}]   ;;  %s2831_s1 = inlined_call_operand.vmem [shape: bf16[512,4], index: 1, kind: input, shape index: {}]   ;;  %s2832_s2 = inlined_call_operand.vmem [shape: f32[512,1], index: 2, kind: input, shape index: {}]   ;;  %s2833_s3 = inlined_call_operand.vmem [shape: bf16[2,512], index: 3, kind: input, shape index: {}]   ;;  %s2834_s4 = inlined_call_operand.vmem [shape: f32[2,1], index: 4, kind: input, shape index: {}]   ;;  %s2835_s5 = inlined_call_operand.vmem [shape: f32[2,2,256], index: 5, kind: output, shape index: {}]  }
   0x1   :  { %s1952_s20 = smov 0  }
   0x2 LB: > { %s27_s21 = sadd.s32 1, %s1910_s19  ;;  %p1753_p0 = scmp.ge.s32.totalorder %s1914_s20, 1  ;;  %s1914_s20 = sphi %s1952_s20, %s15_s20   ;;  %s1910_s19 = sphi %s1950_s19, %s2996_s19   ;;  %s1906_s18 = sphi %s1948_s18, %s2995_s18  }
   0x3   : > { %p29_p1 = scmp.ge.s32.totalorder %s27_s21, 2  ;;  %p208_p2 = scmp.lt.s32.totalorder %s1914_s20, 3 }
   0x5   : > { %s2998_s21 = smov (%p29_p1, %s27_s21), 0  ;;  %p209_p3 = pnand %p1753_p0, %p208_p2 }
   0x7   : > { %212 = sbr.rel (%p209_p3) target bundleno = 645 (0x285), region = 40 }
   0xc   : > { %p245_p4 = scmp.lt.s32.totalorder %s1906_s18, 1  ;;  %v1916_v0 = vmov 0   ;;  %vm982_vm0 = vcmask 1041408   ;;  %v344_v2 = vld [vmem:[%s2832_s2 + $0x70] sm:$0xff]  ;;  %v1860_v5 = vld [vmem:[%s2831_s1] sm:$0xff]   ;;  %v345_v7 = vld [vmem:[%s2832_s2 + $0x78] sm:$0xff] }
   0xd   : > { %1021 = vmatprep.mubr.bf16.mxu0 %v1916_v0  ;;  %1231 = vmatprep.mubr.bf16.mxu1 %v1916_v0  ;;  %v342_v6 = vld [vmem:[%s2832_s2 + $0x60] sm:$0xff]  ;;  %v1861_v8 = vld [vmem:[%s2831_s1 + $0xa8] sm:$0xff]   ;;  %vm885_vm1 = vcmask 31744   ;;  %v340_v10 = vld [vmem:[%s2832_s2 + $0x50] sm:$0xff] }
   0xe   : > { %s3000_s18 = smov (!%p245_p4, %s1906_s18), 1  ;;  %1858 = vset.pattern.permute.xlu0 %v1916_v0  ;;  %1859 = vset.pattern.permute.xlu1 %v1916_v0  ;;  %v343_v9 = vld [vmem:[%s2832_s2 + $0x68] sm:$0xff]  ;;  %v341_v11 = vld [vmem:[%s2832_s2 + $0x58] sm:$0xff]  ;;  %v338_v13 = vld [vmem:[%s2832_s2 + $0x40] sm:$0xff] }
   0xf   : > { %s1828_s22 = sshll.u32 %s3000_s18, 2  ;;  %468 = vperm.xlu0 %1858, %v344_v2   ;;  %458 = vperm.xlu1 %1859, %v342_v6   ;;  %v1862_v12 = vld [vmem:[%s2831_s1 + $0x8] sm:$0xff]   ;;  %v1863_v14 = vld [vmem:[%s2831_s1 + $0xb0] sm:$0xff]   ;;  %v337_v17 = vld [vmem:[%s2832_s2 + $0x38] sm:$0xff] }
  0x10   : > { %s252_s25 = scalar_lea.vmem %s2830_s0, %s1828_s22  ;;  %v339_v15 = vld [vmem:[%s2832_s2 + $0x48] sm:$0xff]  ;;  %v336_v16 = vld [vmem:[%s2832_s2 + $0x30] sm:$0xff]  ;;  %v1865_v19 = vld [vmem:[%s2831_s1 + $0xb8] sm:$0xff]   ;;  %s262_s24 = scalar_lea.vmem %s2835_s5, %s1828_s22 }
  0x11   : > { %v1790_v1 = vld.sshfl [vmem:[%s252_s25] sm:$0x33 pattern:$0x76325410]  ;;  %v1864_v18 = vld [vmem:[%s2831_s1 + $0x10] sm:$0xff]   ;;  %v335_v21 = vld [vmem:[%s2832_s2 + $0x28] sm:$0xff] }
  0x12   : > { %v884_v3 = vcombine.high %v1790_v1, %v1790_v1  ;;  %v984_v4 = vsel %vm982_vm0, %v1790_v1, 0  ;;  %v334_v20 = vld [vmem:[%s2832_s2 + $0x20] sm:$0xff]  ;;  %v332_v22 = vld [vmem:[%s2832_s2 + $0x10] sm:$0xff]  ;;  %v333_v23 = vld [vmem:[%s2832_s2 + $0x18] sm:$0xff] }
  0x13   : > { %473 = vperm.xlu0 %1858, %v345_v7   ;;  %463 = vperm.xlu1 %1859, %v343_v9   ;;  %v330_v24 = vld [vmem:[%s2832_s2] sm:$0xff]  ;;  %v1866_v25 = vld [vmem:[%s2831_s1 + $0x18] sm:$0xff]   ;;  %v331_v27 = vld [vmem:[%s2832_s2 + $0x8] sm:$0xff] }
  0x14   : > { %1791 = vmatprep.subr.msk.bf16.mxu0 %vm982_vm0, %v884_v3  ;;  %1830 = vmatprep.subr.msk.bf16.mxu1 %vm982_vm0, %v884_v3  ;;  %v1867_v26 = vld [vmem:[%s2831_s1 + $0xc0] sm:$0xff]   ;;  %v360_v28 = vld [vmem:[%s2832_s2 + $0xf0] sm:$0xff]  ;;  %v361_v29 = vld [vmem:[%s2832_s2 + $0xf8] sm:$0xff] }
  0x15   : > { %1004 = vmatpush1.bf16.msra.mxu0 %v984_v4  ;;  %1831 = vmatpush1.bf16.msra.mxu1 %v984_v4  ;;  %v1868_v30 = vld [vmem:[%s2831_s1 + $0x20] sm:$0xff]   ;;  %v1869_v31 = vld [vmem:[%s2831_s1 + $0xc8] sm:$0xff]   ;;  %v356_v34 = vld [vmem:[%s2832_s2 + $0xd0] sm:$0xff] }
  0x16   : > { %v358_v32 = vld [vmem:[%s2832_s2 + $0xe0] sm:$0xff]  ;;  %v359_v33 = vld [vmem:[%s2832_s2 + $0xe8] sm:$0xff]  ;;  %v357_v35 = vld [vmem:[%s2832_s2 + $0xd8] sm:$0xff] }
  0x17   : > { %448 = vperm.xlu0 %1858, %v340_v10   ;;  %453 = vperm.xlu1 %1859, %v341_v11   ;;  %v354_v36 = vld [vmem:[%s2832_s2 + $0xc0] sm:$0xff]  ;;  %v1870_v37 = vld [vmem:[%s2831_s1 + $0x28] sm:$0xff]   ;;  %v1871_v38 = vld [vmem:[%s2831_s1 + $0xd0] sm:$0xff]  }
  0x18   : > { %1792 = vmatmul.mubr.msk.bf16.vlgmr.msra.gmra.mxu0 %vm885_vm1, %v1860_v5  ;;  %1813 = vmatmul.mubr.msk.bf16.vlgmr.msra.gmra.mxu1 %vm885_vm1, %v1861_v8  ;;  %v355_v39 = vld [vmem:[%s2832_s2 + $0xc8] sm:$0xff]  ;;  %v352_v40 = vld [vmem:[%s2832_s2 + $0xb0] sm:$0xff]  ;;  %v353_v41 = vld [vmem:[%s2832_s2 + $0xb8] sm:$0xff] }
  0x19   : > { %1031 = vmatprep.mubr.bf16.mxu0 %v1916_v0  ;;  %1241 = vmatprep.mubr.bf16.mxu1 %v1916_v0  ;;  %v350_v42 = vld [vmem:[%s2832_s2 + $0xa0] sm:$0xff]  ;;  %v1872_v43 = vld [vmem:[%s2831_s1 + $0x30] sm:$0xff]   ;;  %v1873_v44 = vld [vmem:[%s2831_s1 + $0xd8] sm:$0xff]  }
  0x1a   : > { %v351_v45 = vld [vmem:[%s2832_s2 + $0xa8] sm:$0xff]  ;;  %v348_v46 = vld [vmem:[%s2832_s2 + $0x90] sm:$0xff]  ;;  %v349_v47 = vld [vmem:[%s2832_s2 + $0x98] sm:$0xff] }
  0x1b   : > { %438 = vperm.xlu0 %1858, %v338_v13   ;;  %443 = vperm.xlu1 %1859, %v339_v15   ;;  %v346_v48 = vld [vmem:[%s2832_s2 + $0x80] sm:$0xff]  ;;  %v1874_v49 = vld [vmem:[%s2831_s1 + $0x38] sm:$0xff]   ;;  %v347_v51 = vld [vmem:[%s2832_s2 + $0x88] sm:$0xff] }
  0x1c   : > { %v1875_v50 = vld [vmem:[%s2831_s1 + $0xe0] sm:$0xff]   ;;  %v376_v52 = vld [vmem:[%s2832_s2 + $0x170] sm:$0xff]  ;;  %v377_v53 = vld [vmem:[%s2832_s2 + $0x178] sm:$0xff] }
  0x1d   : > { %v374_v54 = vld [vmem:[%s2832_s2 + $0x160] sm:$0xff]  ;;  %v1877_v56 = vld [vmem:[%s2831_s1 + $0xe8] sm:$0xff]   ;;  %v372_v58 = vld [vmem:[%s2832_s2 + $0x150] sm:$0xff] }
  0x1e   : > { %v1876_v55 = vld [vmem:[%s2831_s1 + $0x40] sm:$0xff]   ;;  %v375_v57 = vld [vmem:[%s2832_s2 + $0x168] sm:$0xff]  ;;  %v373_v59 = vld [vmem:[%s2832_s2 + $0x158] sm:$0xff] }
  0x1f   : > { %428 = vperm.xlu0 %1858, %v336_v16   ;;  %433 = vperm.xlu1 %1859, %v337_v17   ;;  %v370_v60 = vld [vmem:[%s2832_s2 + $0x140] sm:$0xff]  ;;  %v1878_v61 = vld [vmem:[%s2831_s1 + $0x48] sm:$0xff]   ;;  %v1879_v62 = vld [vmem:[%s2831_s1 + $0xf0] sm:$0xff]  }
  0x20   : > { %1793 = vmatmul.mubr.msk.bf16.gmra.mxu0 %vm885_vm1, %v1862_v12  ;;  %1814 = vmatmul.mubr.msk.bf16.gmra.mxu1 %vm885_vm1, %v1863_v14  ;;  %v371_v63 = vld [vmem:[%s2832_s2 + $0x148] sm:$0xff]  ;;  %v368_v1 = vld [vmem:[%s2832_s2 + $0x130] sm:$0xff]  ;;  %v369_v2 = vld [vmem:[%s2832_s2 + $0x138] sm:$0xff] }
  0x21   : > { %1041 = vmatprep.mubr.bf16.mxu0 %v1916_v0  ;;  %1251 = vmatprep.mubr.bf16.mxu1 %v1916_v0  ;;  %v366_v3 = vld [vmem:[%s2832_s2 + $0x120] sm:$0xff]  ;;  %v1880_v4 = vld [vmem:[%s2831_s1 + $0x50] sm:$0xff]   ;;  %v1881_v5 = vld [vmem:[%s2831_s1 + $0xf8] sm:$0xff]  }
  0x22   : > { %v367_v6 = vld [vmem:[%s2832_s2 + $0x128] sm:$0xff]  ;;  %v364_v7 = vld [vmem:[%s2832_s2 + $0x110] sm:$0xff]  ;;  %v365_v8 = vld [vmem:[%s2832_s2 + $0x118] sm:$0xff] }
  0x23   : > { %418 = vperm.xlu0 %1858, %v334_v20   ;;  %423 = vperm.xlu1 %1859, %v335_v21   ;;  %v362_v9 = vld [vmem:[%s2832_s2 + $0x100] sm:$0xff]  ;;  %v1882_v10 = vld [vmem:[%s2831_s1 + $0x58] sm:$0xff]   ;;  %v363_v11 = vld [vmem:[%s2832_s2 + $0x108] sm:$0xff] }
  0x24   : > { %v392_v12 = vld [vmem:[%s2832_s2 + $0x1f0] sm:$0xff]  ;;  %v393_v13 = vld [vmem:[%s2832_s2 + $0x1f8] sm:$0xff]  ;;  %v390_v14 = vld [vmem:[%s2832_s2 + $0x1e0] sm:$0xff] }
  0x25   : > { %v1883_v15 = vld [vmem:[%s2831_s1 + $0x60] sm:$0xff]   ;;  %v391_v16 = vld [vmem:[%s2832_s2 + $0x1e8] sm:$0xff]  ;;  %v388_v17 = vld [vmem:[%s2832_s2 + $0x1d0] sm:$0xff] }
  0x26   : > { %v1884_v20 = vld [vmem:[%s2831_s1 + $0x68] sm:$0xff]  }
  0x27   : > { %408 = vperm.xlu0 %1858, %v332_v22   ;;  %413 = vperm.xlu1 %1859, %v333_v23   ;;  %v387_v21 = vld [vmem:[%s2832_s2 + $0x1c8] sm:$0xff]  ;;  %v384_v22 = vld [vmem:[%s2832_s2 + $0x1b0] sm:$0xff]  ;;  %v385_v23 = vld [vmem:[%s2832_s2 + $0x1b8] sm:$0xff] }
  0x28   : > { %1794 = vmatmul.mubr.msk.bf16.gmra.mxu0 %vm885_vm1, %v1864_v18  ;;  %1815 = vmatmul.mubr.msk.bf16.gmra.mxu1 %vm885_vm1, %v1865_v19  ;;  %v389_v18 = vld [vmem:[%s2832_s2 + $0x1d8] sm:$0xff]  ;;  %v386_v19 = vld [vmem:[%s2832_s2 + $0x1c0] sm:$0xff] }
  0x29   : > { %1051 = vmatprep.mubr.bf16.mxu0 %v1916_v0  ;;  %1261 = vmatprep.mubr.bf16.mxu1 %v1916_v0 }
  0x2b   : > { %398 = vperm.xlu0 %1858, %v330_v24   ;;  %403 = vperm.xlu1 %1859, %v331_v27   ;;  %v382_v24 = vld [vmem:[%s2832_s2 + $0x1a0] sm:$0xff]  ;;  %v380_v27 = vld [vmem:[%s2832_s2 + $0x190] sm:$0xff] }
  0x2f   : > { %548 = vperm.xlu0 %1858, %v360_v28   ;;  %553 = vperm.xlu1 %1859, %v361_v29   ;;  %v381_v28 = vld [vmem:[%s2832_s2 + $0x198] sm:$0xff]  ;;  %v378_v29 = vld [vmem:[%s2832_s2 + $0x180] sm:$0xff] }
  0x30   : > { %1795 = vmatmul.mubr.msk.bf16.gmra.mxu0 %vm885_vm1, %v1866_v25  ;;  %1816 = vmatmul.mubr.msk.bf16.gmra.mxu1 %vm885_vm1, %v1867_v26  ;;  %v1885_v25 = vld [vmem:[%s2831_s1 + $0x70] sm:$0xff]   ;;  %v383_v26 = vld [vmem:[%s2832_s2 + $0x1a8] sm:$0xff] }
  0x31   : > { %1061 = vmatprep.mubr.bf16.mxu0 %v1916_v0  ;;  %1271 = vmatprep.mubr.bf16.mxu1 %v1916_v0 }
  0x33   : > { %538 = vperm.xlu0 %1858, %v358_v32   ;;  %543 = vperm.xlu1 %1859, %v359_v33  }
  0x37   : > { %528 = vperm.xlu0 %1858, %v356_v34   ;;  %533 = vperm.xlu1 %1859, %v357_v35   ;;  %v394_v34 = vld [vmem:[%s2834_s4] sm:$0x3] }
  0x38   : > { %1796 = vmatmul.mubr.msk.bf16.gmra.mxu0 %vm885_vm1, %v1868_v30  ;;  %1817 = vmatmul.mubr.msk.bf16.gmra.mxu1 %vm885_vm1, %v1869_v31  ;;  %v1886_v30 = vld [vmem:[%s2831_s1 + $0x78] sm:$0xff]   ;;  %v379_v31 = vld [vmem:[%s2832_s2 + $0x188] sm:$0xff] }
  0x39   : > { %1071 = vmatprep.mubr.bf16.mxu0 %v1916_v0  ;;  %1281 = vmatprep.mubr.bf16.mxu1 %v1916_v0 }
  0x3b   : > { %518 = vperm.xlu0 %1858, %v354_v36   ;;  %523 = vperm.xlu1 %1859, %v355_v39  }
  0x3f   : > { %508 = vperm.xlu0 %1858, %v352_v40   ;;  %513 = vperm.xlu1 %1859, %v353_v41  }
  0x40   : > { %1797 = vmatmul.mubr.msk.bf16.gmra.mxu0 %vm885_vm1, %v1870_v37  ;;  %1818 = vmatmul.mubr.msk.bf16.gmra.mxu1 %vm885_vm1, %v1871_v38  ;;  %v1887_v37 = vld [vmem:[%s2831_s1 + $0x80] sm:$0xff]  }
  0x41   : > { %1081 = vmatprep.mubr.bf16.mxu0 %v1916_v0  ;;  %1291 = vmatprep.mubr.bf16.mxu1 %v1916_v0 }
  0x43   : > { %498 = vperm.xlu0 %1858, %v350_v42   ;;  %503 = vperm.xlu1 %1859, %v351_v45   ;;  %v1888_v42 = vld [vmem:[%s2831_s1 + $0x88] sm:$0xff]  }
  0x47   : > { %488 = vperm.xlu0 %1858, %v348_v46   ;;  %493 = vperm.xlu1 %1859, %v349_v47   ;;  %v1889_v47 = vld [vmem:[%s2831_s1 + $0x90] sm:$0xff]  }
  0x48   : > { %1798 = vmatmul.mubr.msk.bf16.gmra.mxu0 %vm885_vm1, %v1872_v43  ;;  %1819 = vmatmul.mubr.msk.bf16.gmra.mxu1 %vm885_vm1, %v1873_v44 }
  0x49   : > { %1091 = vmatprep.mubr.bf16.mxu0 %v1916_v0  ;;  %1301 = vmatprep.mubr.bf16.mxu1 %v1916_v0 }
  0x4b   : > { %478 = vperm.xlu0 %1858, %v346_v48   ;;  %483 = vperm.xlu1 %1859, %v347_v51  }
  0x4f   : > { %628 = vperm.xlu0 %1858, %v376_v52   ;;  %633 = vperm.xlu1 %1859, %v377_v53   ;;  %v1890_v52 = vld [vmem:[%s2831_s1 + $0x98] sm:$0xff]  }
  0x50   : > { %1799 = vmatmul.mubr.msk.bf16.gmra.mxu0 %vm885_vm1, %v1874_v49  ;;  %1820 = vmatmul.mubr.msk.bf16.gmra.mxu1 %vm885_vm1, %v1875_v50 }
  0x51   : > { %1101 = vmatprep.mubr.bf16.mxu0 %v1916_v0  ;;  %1311 = vmatprep.mubr.bf16.mxu1 %v1916_v0 }
  0x53   : > { %618 = vperm.xlu0 %1858, %v374_v54   ;;  %623 = vperm.xlu1 %1859, %v375_v57   ;;  %v1891_v57 = vld [vmem:[%s2831_s1 + $0xa0] sm:$0xff]  }
  0x57   : > { %608 = vperm.xlu0 %1858, %v372_v58   ;;  %613 = vperm.xlu1 %1859, %v373_v59  }
  0x58   : > { %1800 = vmatmul.mubr.msk.bf16.gmra.mxu0 %vm885_vm1, %v1876_v55  ;;  %1821 = vmatmul.mubr.msk.bf16.gmra.mxu1 %vm885_vm1, %v1877_v56 }
  0x59   : > { %1111 = vmatprep.mubr.bf16.mxu0 %v1916_v0  ;;  %1321 = vmatprep.mubr.bf16.mxu1 %v1916_v0 }
  0x5b   : > { %598 = vperm.xlu0 %1858, %v370_v60   ;;  %603 = vperm.xlu1 %1859, %v371_v63  }
  0x5f   : > { %588 = vperm.xlu0 %1858, %v368_v1   ;;  %593 = vperm.xlu1 %1859, %v369_v2  }
  0x60   : > { %1801 = vmatmul.mubr.msk.bf16.gmra.mxu0 %vm885_vm1, %v1878_v61  ;;  %1822 = vmatmul.mubr.msk.bf16.gmra.mxu1 %vm885_vm1, %v1879_v62 }
  0x61   : > { %1121 = vmatprep.mubr.bf16.mxu0 %v1916_v0  ;;  %1331 = vmatprep.mubr.bf16.mxu1 %v1916_v0 }
  0x63   : > { %578 = vperm.xlu0 %1858, %v366_v3   ;;  %583 = vperm.xlu1 %1859, %v367_v6  }
  0x67   : > { %568 = vperm.xlu0 %1858, %v364_v7   ;;  %573 = vperm.xlu1 %1859, %v365_v8  }
  0x68   : > { %1802 = vmatmul.mubr.msk.bf16.gmra.mxu0 %vm885_vm1, %v1880_v4  ;;  %1823 = vmatmul.mubr.msk.bf16.gmra.mxu1 %vm885_vm1, %v1881_v5 }
  0x69   : > { %1131 = vmatprep.mubr.bf16.mxu0 %v1916_v0 }
  0x6b   : > { %558 = vperm.xlu0 %1858, %v362_v9   ;;  %563 = vperm.xlu1 %1859, %v363_v11  }
  0x6f   : > { %708 = vperm.xlu0 %1858, %v392_v12   ;;  %713 = vperm.xlu1 %1859, %v393_v13  }
  0x70   : > { %1803 = vmatmul.mubr.msk.bf16.gmra.mxu0 %vm885_vm1, %v1882_v10 }
  0x71   : > { %1141 = vmatprep.mubr.bf16.mxu0 %v1916_v0 }
  0x73   : > { %698 = vperm.xlu0 %1858, %v390_v14   ;;  %703 = vperm.xlu1 %1859, %v391_v16  }
  0x77   : > { %688 = vperm.xlu0 %1858, %v388_v17   ;;  %693 = vperm.xlu1 %1859, %v389_v18  }
  0x78   : > { %1804 = vmatmul.mubr.msk.bf16.gmra.mxu0 %vm885_vm1, %v1883_v15 }
  0x79   : > { %1151 = vmatprep.mubr.bf16.mxu0 %v1916_v0 }
  0x7b   : > { %678 = vperm.xlu0 %1858, %v386_v19   ;;  %683 = vperm.xlu1 %1859, %v387_v21  }
  0x7f   : > { %668 = vperm.xlu0 %1858, %v384_v22   ;;  %673 = vperm.xlu1 %1859, %v385_v23  }
  0x80   : > { %1805 = vmatmul.mubr.msk.bf16.gmra.mxu0 %vm885_vm1, %v1884_v20 }
  0x81   : > { %1161 = vmatprep.mubr.bf16.mxu0 %v1916_v0 }
  0x83   : > { %658 = vperm.xlu0 %1858, %v382_v24   ;;  %663 = vperm.xlu1 %1859, %v383_v26  }
  0x87   : > { %648 = vperm.xlu0 %1858, %v380_v27   ;;  %653 = vperm.xlu1 %1859, %v381_v28  }
  0x88   : > { %1806 = vmatmul.mubr.msk.bf16.gmra.mxu0 %vm885_vm1, %v1885_v25 }
  0x89   : > { %1171 = vmatprep.mubr.bf16.mxu0 %v1916_v0 }
  0x8a   : > { %v2302_v32 = vpop.permute.xlu0 %468  ;;  %v2304_v33 = vpop.permute.xlu1 %458 }
  0x8b   : > { %638 = vperm.xlu0 %1858, %v378_v29   ;;  %643 = vperm.xlu1 %1859, %v379_v31  }
  0x8e   : > { %v2311_v35 = vpop.permute.xlu0 %473  ;;  %v2313_v36 = vpop.permute.xlu1 %463 }
  0x8f   : > { %1536 = vperm.xlu0 %1858, %v394_v34  }
  0x90   : > { %1807 = vmatmul.mubr.msk.bf16.gmra.mxu0 %vm885_vm1, %v1886_v30 }
  0x91   : > { %1181 = vmatprep.mubr.bf16.mxu0 %v1916_v0 }
  0x92   : > { %v2318_v38 = vpop.permute.xlu0 %448  ;;  %v2320_v39 = vpop.permute.xlu1 %453 }
  0x96   : > { %v2324_v40 = vpop.permute.xlu0 %438  ;;  %v2326_v41 = vpop.permute.xlu1 %443 }
  0x98   : > { %1808 = vmatmul.mubr.msk.bf16.gmra.mxu0 %vm885_vm1, %v1887_v37 }
  0x99   : > { %1191 = vmatprep.mubr.bf16.mxu0 %v1916_v0 }
  0x9a   : > { %v2331_v43 = vpop.permute.xlu0 %428  ;;  %v2333_v44 = vpop.permute.xlu1 %433 }
  0x9e   : > { %v2337_v45 = vpop.permute.xlu0 %418  ;;  %v2339_v46 = vpop.permute.xlu1 %423 }
  0xa0   : > { %1809 = vmatmul.mubr.msk.bf16.gmra.mxu0 %vm885_vm1, %v1888_v42 }
  0xa1   : > { %1201 = vmatprep.mubr.bf16.mxu0 %v1916_v0 }
  0xa2   : > { %v2344_v48 = vpop.permute.xlu0 %408  ;;  %v2346_v49 = vpop.permute.xlu1 %413 }
  0xa6   : > { %v399_v50 = vpop.permute.xlu0 %398  ;;  %v404_v51 = vpop.permute.xlu1 %403 }
  0xa8   : > { %1810 = vmatmul.mubr.msk.bf16.gmra.mxu0 %vm885_vm1, %v1889_v47 }
  0xa9   : > { %1211 = vmatprep.mubr.bf16.mxu0 %v1916_v0 }
  0xaa   : > { %v2353_v53 = vpop.permute.xlu0 %548  ;;  %v2355_v54 = vpop.permute.xlu1 %553 }
  0xab   : > { %2878 = vst [vmem:[#allocation2_spill] sm:$0xff] %v2353_v53  ;;  %2879 = vst [vmem:[#allocation3_spill] sm:$0xff] %v2355_v54 }
  0xae   : > { %v2359_v55 = vpop.permute.xlu0 %538  ;;  %v2361_v56 = vpop.permute.xlu1 %543 }
  0xaf   : > { %2880 = vst [vmem:[#allocation4_spill] sm:$0xff] %v2359_v55  ;;  %2881 = vst [vmem:[#allocation5_spill] sm:$0xff] %v2361_v56 }
  0xb0   : > { %1811 = vmatmul.mubr.msk.bf16.gmra.mxu0 %vm885_vm1, %v1890_v52 }
  0xb1   : > { %1221 = vmatprep.mubr.bf16.mxu0 %v1916_v0 }
  0xb2   : > { %v2366_v58 = vpop.permute.xlu0 %528  ;;  %v2368_v59 = vpop.permute.xlu1 %533 }
  0xb3   : > { %2882 = vst [vmem:[#allocation6_spill] sm:$0xff] %v2366_v58  ;;  %2883 = vst [vmem:[#allocation7_spill] sm:$0xff] %v2368_v59 }
  0xb6   : > { %v2371_v60 = vpop.permute.xlu0 %518  ;;  %v2373_v61 = vpop.permute.xlu1 %523 }
  0xb7   : > { %2884 = vst [vmem:[#allocation8_spill] sm:$0xff] %v2371_v60  ;;  %2885 = vst [vmem:[#allocation9_spill] sm:$0xff] %v2373_v61 }
  0xb8   : > { %1812 = vmatmul.mubr.msk.bf16.gmra.mxu0 %vm885_vm1, %v1891_v57 }
  0xba   : > { %v2375_v62 = vpop.permute.xlu0 %508  ;;  %v2377_v0 = vpop.permute.xlu1 %513 }
  0xbb   : > { %2886 = vst [vmem:[#allocation10_spill] sm:$0xff] %v2375_v62  ;;  %2887 = vst [vmem:[#allocation11_spill] sm:$0xff] %v2377_v0 }
  0xbe   : > { %v2379_v63 = vpop.permute.xlu0 %498  ;;  %v2381_v1 = vpop.permute.xlu1 %503 }
  0xbf   : > { %2888 = vst [vmem:[#allocation12_spill] sm:$0xff] %v2379_v63  ;;  %2889 = vst [vmem:[#allocation13_spill] sm:$0xff] %v2381_v1 }
  0xc2   : > { %v2383_v2 = vpop.permute.xlu0 %488  ;;  %v2385_v3 = vpop.permute.xlu1 %493 }
  0xc6   : > { %v2387_v4 = vpop.permute.xlu0 %478  ;;  %v2389_v5 = vpop.permute.xlu1 %483 }
  0xca   : > { %v2391_v6 = vpop.permute.xlu0 %628  ;;  %v2393_v7 = vpop.permute.xlu1 %633 }
  0xcb   : > { %2890 = vst [vmem:[#allocation14_spill] sm:$0xff] %v2391_v6  ;;  %2891 = vst [vmem:[#allocation15_spill] sm:$0xff] %v2393_v7 }
  0xce   : > { %v2395_v8 = vpop.permute.xlu0 %618  ;;  %v2397_v9 = vpop.permute.xlu1 %623 }
  0xcf   : > { %2892 = vst [vmem:[#allocation16_spill] sm:$0xff] %v2395_v8  ;;  %2893 = vst [vmem:[#allocation17_spill] sm:$0xff] %v2397_v9 }
  0xd2   : > { %v2399_v10 = vpop.permute.xlu0 %608  ;;  %v2401_v11 = vpop.permute.xlu1 %613 }
  0xd3   : > { %2894 = vst [vmem:[#allocation18_spill] sm:$0xff] %v2399_v10  ;;  %2895 = vst [vmem:[#allocation19_spill] sm:$0xff] %v2401_v11 }
  0xd6   : > { %v2405_v14 = vpop.permute.xlu0 %598  ;;  %v2409_v18 = vpop.permute.xlu1 %603 }
  0xd7   : > { %2897 = vst [vmem:[#allocation21_spill] sm:$0xff] %v2405_v14  ;;  %2899 = vst [vmem:[#allocation23_spill] sm:$0xff] %v2409_v18 }
  0xd8   : > { %v1023_v12 = vpop.f32.mrf.mxu0  ;;  %v2403_v13 = vpop.f32.mrf.mxu1 }
  0xd9   : > { %2896 = vst [vmem:[#allocation20_spill] sm:$0xff] %v2403_v13  ;;  %v1024_v17 = vadd.f32 %v1023_v12, %v399_v50 }
  0xda   : > { %v1025_v15 = vpop.f32.mrf.mxu0  ;;  %v2407_v16 = vpop.f32.mrf.mxu1 }
  0xdb   : > { %2898 = vst [vmem:[#allocation22_spill] sm:$0xff] %v2407_v16  ;;  %v1026_v21 = vadd.f32 %v1025_v15, %v399_v50  ;;  %v2413_v23 = vpop.permute.xlu0 %588  ;;  %v1342_v26 = vmax.f32 %v1024_v17, 0.0  ;;  %v2417_v29 = vpop.permute.xlu1 %593 }
  0xdc   : > { %v1027_v19 = vpop.f32.mrf.mxu0  ;;  %v2411_v20 = vpop.f32.mrf.mxu1  ;;  %2901 = vst [vmem:[#allocation25_spill] sm:$0xff] %v2413_v23  ;;  %2903 = vst [vmem:[#allocation27_spill] sm:$0xff] %v2417_v29 }
  0xdd   : > { %2900 = vst [vmem:[#allocation24_spill] sm:$0xff] %v2411_v20  ;;  %v1028_v22 = vadd.f32 %v1027_v19, %v404_v51  ;;  %v1343_v34 = vmax.f32 %v1026_v21, 0.0  ;;  %v1917_v20 = vmov 1966171168  }
  0xde   : > { %v1029_v24 = vpop.f32.mrf.mxu0  ;;  %v2415_v25 = vpop.f32.mrf.mxu1  ;;  %v1549_v13 = vunpack.c.l.s4 %v1917_v20 }
  0xdf   : > { %2902 = vst [vmem:[#allocation26_spill] sm:$0xff] %v2415_v25  ;;  %v1344_v27 = vmax.f32 %v1028_v22, 0.0  ;;  %v1030_v28 = vadd.f32 %v1029_v24, %v404_v51  ;;  %v2423_v47 = vpop.permute.xlu0 %578  ;;  %v2430_v15 = vpop.permute.xlu1 %583 }
  0xe0   : > { %v1033_v30 = vpop.f32.mrf.mxu0  ;;  %v2419_v31 = vpop.f32.mrf.mxu1  ;;  %2906 = vst [vmem:[#allocation30_spill] sm:$0xff] %v2423_v47  ;;  %2908 = vst [vmem:[#allocation32_spill] sm:$0xff] %v2430_v15 }
  0xe1   : > { %2904 = vst [vmem:[#allocation28_spill] sm:$0xff] %v2419_v31  ;;  %v2421_v37 = vpack.c.bf16 %v1344_v27, %v1342_v26  ;;  %v1345_v42 = vmax.f32 %v1030_v28, 0.0  ;;  %v1034_v12 = vadd.f32 %v1033_v30, %v2344_v48 }
  0xe2   : > { %v1035_v50 = vpop.f32.mrf.mxu0  ;;  %v2425_v52 = vpop.f32.mrf.mxu1 }
  0xe3   : > { %2905 = vst [vmem:[#allocation29_spill] sm:$0xff] %v2421_v37  ;;  %2907 = vst [vmem:[#allocation31_spill] sm:$0xff] %v2425_v52  ;;  %v2427_v57 = vpack.c.bf16 %v1345_v42, %v1343_v34  ;;  %v1036_v19 = vadd.f32 %v1035_v50, %v2344_v48  ;;  %v2436_v22 = vpop.permute.xlu0 %568  ;;  %v1346_v27 = vmax.f32 %v1034_v12, 0.0  ;;  %v2441_v42 = vpop.permute.xlu1 %573 }
  0xe4   : > { %v1037_v51 = vpop.f32.mrf.mxu0  ;;  %v2432_v17 = vpop.f32.mrf.mxu1  ;;  %2910 = vst [vmem:[#allocation34_spill] sm:$0xff] %v2436_v22  ;;  %2912 = vst [vmem:[#allocation36_spill] sm:$0xff] %v2441_v42 }
  0xe5   : > { %2909 = vst [vmem:[#allocation33_spill] sm:$0xff] %v2432_v17  ;;  %v1038_v21 = vadd.f32 %v1037_v51, %v2346_v49  ;;  %v1347_v15 = vmax.f32 %v1036_v19, 0.0 }
  0xe6   : > { %v1039_v24 = vpop.f32.mrf.mxu0  ;;  %v2438_v26 = vpop.f32.mrf.mxu1 }
  0xe7   : > { %2911 = vst [vmem:[#allocation35_spill] sm:$0xff] %v2438_v26  ;;  %v1348_v28 = vmax.f32 %v1038_v21, 0.0  ;;  %v1040_v34 = vadd.f32 %v1039_v24, %v2346_v49  ;;  %v2449_v50 = vpop.permute.xlu0 %558  ;;  %v2457_v21 = vpop.permute.xlu1 %563 }
  0xe8   : > { %v2443_v30 = vpop.f32.mrf.mxu0  ;;  %v2445_v47 = vpop.f32.mrf.mxu1  ;;  %2914 = vst [vmem:[#allocation38_spill] sm:$0xff] %v2449_v50  ;;  %2916 = vst [vmem:[#allocation40_spill] sm:$0xff] %v2457_v21 }
  0xe9   : > { %2913 = vst [vmem:[#allocation37_spill] sm:$0xff] %v2445_v47  ;;  %v2447_v23 = vpack.c.bf16 %v1348_v28, %v1346_v27  ;;  %v1349_v48 = vmax.f32 %v1040_v34, 0.0 }
  0xea   : > { %v2451_v51 = vpop.f32.mrf.mxu0  ;;  %v2453_v22 = vpop.f32.mrf.mxu1 }
  0xeb   : > { %2915 = vst [vmem:[#allocation39_spill] sm:$0xff] %v2453_v22  ;;  %v2455_v12 = vpack.c.bf16 %v1349_v48, %v1347_v15  ;;  %v2463_v42 = vpop.permute.xlu0 %708  ;;  %v2469_v28 = vpop.permute.xlu1 %713 }
  0xec   : > { %v2459_v49 = vpop.f32.mrf.mxu0  ;;  %v2461_v24 = vpop.f32.mrf.mxu1  ;;  %2918 = vst [vmem:[#allocation42_spill] sm:$0xff] %v2463_v42  ;;  %2920 = vst [vmem:[#allocation44_spill] sm:$0xff] %v2469_v28  ;;  %v1551_v28 = vlaneseq }
  0xed   : > { %2917 = vst [vmem:[#allocation41_spill] sm:$0xff] %v2461_v24 }
  0xee   : > { %v2465_v19 = vpop.f32.mrf.mxu0  ;;  %v2467_v27 = vpop.f32.mrf.mxu1  ;;  %v1552_v31 = vshrl.u32 %v1551_v28, 7 }
  0xef   : > { %2919 = vst [vmem:[#allocation43_spill] sm:$0xff] %v2467_v27  ;;  %v2475_v15 = vpop.permute.xlu0 %698  ;;  %v2479_v29 = vpop.permute.xlu1 %703 }
  0xf0   : > { %v2471_v34 = vpop.f32.mrf.mxu0  ;;  %v2473_v50 = vpop.f32.mrf.mxu1  ;;  %2921 = vst [vmem:[#allocation45_spill] sm:$0xff] %v2475_v15  ;;  %2922 = vst [vmem:[#allocation46_spill] sm:$0xff] %v2479_v29  ;;  %v1550_v15 = vunpack.c.0.s8 %v1549_v13  ;;  %v1824_v29 = vld.sshfl [vmem:[%s2833_s3] sm:$0x33 pattern:$0x75316420] }
  0xf2   : > { %v2477_v48 = vpop.f32.mrf.mxu0  ;;  %v1265_v21 = vpop.f32.mrf.mxu1  ;;  %v1553_v52 = vsub.s32 %v1550_v15, %v1552_v31 }
  0xf3   : > { %v2485_v14 = vpop.permute.xlu0 %688  ;;  %v2489_v17 = vpop.permute.xlu1 %693 }
  0xf4   : > { %v2481_v18 = vpop.f32.mrf.mxu0  ;;  %v2483_v42 = vpop.f32.mrf.mxu1  ;;  %2923 = vst [vmem:[#allocation47_spill] sm:$0xff] %v2485_v14  ;;  %2924 = vst [vmem:[#allocation48_spill] sm:$0xff] %v2489_v17  ;;  %v1547_v14 = vcombine.high %v1824_v29, %v1824_v29  ;;  %v2504_v28 = vrot.slane %v1824_v29, %v1553_v52 }
  0xf6   : > { %v2487_v25 = vpop.f32.mrf.mxu0  ;;  %v1269_v11 = vpop.f32.mrf.mxu1  ;;  %2927 = vst [vmem:[#allocation51_spill] sm:$0xff] %v2504_v28  ;;  %v2506_v17 = vrot.slane %v1547_v14, %v1553_v52 }
  0xf7   : > { %v2496_v26 = vpop.permute.xlu0 %678  ;;  %v2500_v8 = vpop.permute.xlu1 %683 }
  0xf8   : > { %v2491_v16 = vpop.f32.mrf.mxu0  ;;  %v1273_v10 = vpop.f32.mrf.mxu1  ;;  %2925 = vst [vmem:[#allocation49_spill] sm:$0xff] %v2496_v26  ;;  %2926 = vst [vmem:[#allocation50_spill] sm:$0xff] %v2500_v8  ;;  %1600 = vmatprep.mubr.bf16.mxu1 %v2506_v17 }
  0xf9   : > { %2928 = vst [vmem:[#allocation52_spill] sm:$0xff] %v2506_v17 }
  0xfa   : > { %v2498_v9 = vpop.f32.mrf.mxu0  ;;  %v1275_v20 = vpop.f32.mrf.mxu1 }
  0xfb   : > { %v2508_v47 = vpop.permute.xlu0 %668  ;;  %v2513_v26 = vpop.permute.xlu1 %673 }
  0xfc   : > { %v2502_v24 = vpop.f32.mrf.mxu0  ;;  %v1277_v13 = vpop.f32.mrf.mxu1  ;;  %2929 = vst [vmem:[#allocation53_spill] sm:$0xff] %v2508_v47  ;;  %2930 = vst [vmem:[#allocation54_spill] sm:$0xff] %v2513_v26 }
  0xfe   : > { %v2510_v27 = vpop.f32.mrf.mxu0  ;;  %v1279_v7 = vpop.f32.mrf.mxu1 }
  0xff   : > { %v2517_v15 = vpop.permute.xlu0 %658  ;;  %v2522_v29 = vpop.permute.xlu1 %663 }
 0x100   : > { %v2515_v22 = vpop.f32.mrf.mxu0  ;;  %v1283_v31 = vpop.f32.mrf.mxu1  ;;  %2931 = vst [vmem:[#allocation55_spill] sm:$0xff] %v2517_v15  ;;  %2933 = vst [vmem:[#allocation57_spill] sm:$0xff] %v2522_v29 }
 0x101   : > { %v1284_v14 = vadd.f32 %v1283_v31, %v2517_v15 }
 0x102   : > { %v1075_v8 = vpop.f32.mrf.mxu0  ;;  %v2519_v6 = vpop.f32.mrf.mxu1 }
 0x103   : > { %2932 = vst [vmem:[#allocation56_spill] sm:$0xff] %v2519_v6  ;;  %v649_v63 = vpop.permute.xlu0 %648  ;;  %v1446_v1 = vmax.f32 %v1284_v14, 0.0  ;;  %v654_v60 = vpop.permute.xlu1 %653 }
 0x104   : > { %v1077_v52 = vpop.f32.mrf.mxu0  ;;  %v1287_v47 = vpop.f32.mrf.mxu1  ;;  %v1274_v26 = vadd.f32 %v1273_v10, %v649_v63  ;;  %v1276_v0 = vadd.f32 %v1275_v20, %v649_v63  ;;  %v1278_v59 = vadd.f32 %v1277_v13, %v654_v60  ;;  %v1280_v55 = vadd.f32 %v1279_v7, %v654_v60 }
 0x105   : > { %v1288_v28 = vadd.f32 %v1287_v47, %v2522_v29 }
 0x106   : > { %v1079_v17 = vpop.f32.mrf.mxu0  ;;  %v1442_v58 = vmax.f32 %v1274_v26, 0.0  ;;  %v1444_v31 = vmax.f32 %v1278_v59, 0.0  ;;  %v1443_v15 = vmax.f32 %v1276_v0, 0.0  ;;  %v1445_v47 = vmax.f32 %v1280_v55, 0.0 }
 0x107   : > { %v1448_v62 = vmax.f32 %v1288_v28, 0.0  ;;  %v639_v53 = vpop.permute.xlu0 %638  ;;  %v644_v56 = vpop.permute.xlu1 %643 }
 0x108   : > { %v1083_v61 = vpop.f32.mrf.mxu0  ;;  %v2527_v29 = vpack.c.bf16 %v1444_v31, %v1442_v58  ;;  %v1264_v10 = vadd.f32 %v2473_v50, %v639_v53  ;;  %v1266_v28 = vadd.f32 %v1265_v21, %v639_v53  ;;  %v1268_v26 = vadd.f32 %v2483_v42, %v644_v56 }
 0x109   : > { %v2525_v54 = vpack.c.bf16 %v1448_v62, %v1446_v1  ;;  %v1270_v60 = vadd.f32 %v1269_v11, %v644_v56  ;;  %v2531_v59 = vpack.c.bf16 %v1445_v47, %v1443_v15 }
 0x10a   : > { %v1085_v6 = vpop.f32.mrf.mxu0  ;;  %v1438_v20 = vmax.f32 %v1264_v10, 0.0  ;;  %v1439_v14 = vmax.f32 %v1266_v28, 0.0  ;;  %v1440_v62 = vmax.f32 %v1268_v26, 0.0  ;;  %v1080_v28 = vadd.f32 %v1079_v17, %v2320_v39 }
 0x10b   : > { %v1441_v1 = vmax.f32 %v1270_v60, 0.0  ;;  %v1086_v11 = vadd.f32 %v1085_v6, %v2304_v33  ;;  %v1084_v26 = vadd.f32 %v1083_v61, %v2304_v33 }
 0x10c   : > { %v1087_v37 = vpop.f32.mrf.mxu0  ;;  %v2533_v13 = vpack.c.bf16 %v1440_v62, %v1438_v20 }
 0x10d   : > { %v2535_v55 = vpack.c.bf16 %v1441_v1, %v1439_v14  ;;  %v1088_v31 = vadd.f32 %v1087_v37, %v2313_v36 }
 0x10e   : > { %v1089_v63 = vpop.f32.mrf.mxu0  ;;  %2934 = vst [vmem:[#allocation58_spill] sm:$0xff] %v2533_v13 }
 0x10f   : > { %2935 = vst [vmem:[#allocation59_spill] sm:$0xff] %v2535_v55  ;;  %v1090_v50 = vadd.f32 %v1089_v63, %v2313_v36  ;;  %v1078_v36 = vadd.f32 %v1077_v52, %v2320_v39  ;;  %v1368_v37 = vmax.f32 %v1088_v31, 0.0  ;;  %v1366_v39 = vmax.f32 %v1084_v26, 0.0 }
 0x110   : > { %v1093_v7 = vpop.f32.mrf.mxu0  ;;  %v1050_v26 = vadd.f32 %v2465_v19, %v2339_v46 }
 0x111   : > { %v1094_v42 = vadd.f32 %v1093_v7, %v2302_v32  ;;  %v1369_v20 = vmax.f32 %v1090_v50, 0.0  ;;  %v1367_v7 = vmax.f32 %v1086_v11, 0.0  ;;  %v1068_v11 = vadd.f32 %v2502_v24, %v2326_v41 }
 0x112   : > { %v1095_v0 = vpop.f32.mrf.mxu0  ;;  %v1482_v31 = vpack.c.bf16 %v1368_v37, %v1366_v39 }
 0x113   : > { %v1096_v53 = vadd.f32 %v1095_v0, %v2302_v32  ;;  %v1370_v60 = vmax.f32 %v1094_v42, 0.0  ;;  %v1076_v32 = vadd.f32 %v1075_v8, %v2318_v38  ;;  %v1483_v50 = vpack.c.bf16 %v1369_v20, %v1367_v7 }
 0x114   : > { %v1097_v58 = vpop.f32.mrf.mxu0  ;;  %v1060_v8 = vadd.f32 %v2487_v25, %v2333_v44  ;;  %v1364_v25 = vmax.f32 %v1078_v36, 0.0 }
 0x115   : > { %v1098_v21 = vadd.f32 %v1097_v58, %v2311_v35  ;;  %v1371_v14 = vmax.f32 %v1096_v53, 0.0  ;;  %v1365_v58 = vmax.f32 %v1080_v28, 0.0  ;;  %v1066_v53 = vadd.f32 %v2498_v9, %v2324_v40 }
 0x116   : > { %v1099_v56 = vpop.f32.mrf.mxu0 }
 0x117   : > { %v1100_v15 = vadd.f32 %v1099_v56, %v2311_v35  ;;  %v1372_v47 = vmax.f32 %v1098_v21, 0.0  ;;  %v1070_v35 = vadd.f32 %v2510_v27, %v2326_v41  ;;  %v1074_v27 = vadd.f32 %v2515_v22, %v2318_v38 }
 0x118   : > { %v1103_v10 = vpop.f32.mrf.mxu0  ;;  %v1363_v21 = vmax.f32 %v1076_v32, 0.0  ;;  %v1064_v22 = vadd.f32 %v2491_v16, %v2324_v40  ;;  %v1357_v32 = vmax.f32 %v1060_v8, 0.0  ;;  %v1044_v8 = vadd.f32 %v2443_v30, %v2337_v45 }
 0x119   : > { %v1373_v63 = vmax.f32 %v1100_v15, 0.0  ;;  %v1104_v6 = vadd.f32 %v1103_v10, %v2387_v4  ;;  %v1484_v17 = vpack.c.bf16 %v1372_v47, %v1370_v60  ;;  %v1361_v15 = vmax.f32 %v1070_v35, 0.0 }
 0x11a   : > { %v1105_v62 = vpop.f32.mrf.mxu0  ;;  %v1481_v9 = vpack.c.bf16 %v1365_v58, %v1363_v21  ;;  %v1362_v20 = vmax.f32 %v1074_v27, 0.0  ;;  %v1058_v60 = vadd.f32 %v2481_v18, %v2333_v44  ;;  %v1054_v35 = vadd.f32 %v2471_v34, %v2331_v43 }
 0x11b   : > { %v1485_v1 = vpack.c.bf16 %v1373_v63, %v1371_v14  ;;  %v1106_v33 = vadd.f32 %v1105_v62, %v2387_v4  ;;  %v1374_v42 = vmax.f32 %v1104_v6, 0.0  ;;  %v1359_v63 = vmax.f32 %v1066_v53, 0.0 }
 0x11c   : > { %v1107_v0 = vpop.f32.mrf.mxu0  ;;  %v1360_v62 = vmax.f32 %v1068_v11, 0.0  ;;  %v1480_v40 = vpack.c.bf16 %v1364_v25, %v1362_v20  ;;  %v1046_v6 = vadd.f32 %v2451_v51, %v2337_v45  ;;  %v1358_v36 = vmax.f32 %v1064_v22, 0.0 }
 0x11d   : > { %v1108_v61 = vadd.f32 %v1107_v0, %v2389_v5  ;;  %1568 = vmatprep.subr.bf16.mxu1 %v1485_v1  ;;  %v1375_v10 = vmax.f32 %v1106_v33, 0.0  ;;  %v1479_v7 = vpack.c.bf16 %v1361_v15, %v1359_v63  ;;  %v1353_v0 = vmax.f32 %v1050_v26, 0.0 }
 0x11e   : > { %v1109_v52 = vpop.f32.mrf.mxu0  ;;  %1569 = vmatpush1.bf16.msra.mxu1 %v1484_v17  ;;  %v1356_v58 = vmax.f32 %v1058_v60, 0.0  ;;  %v1354_v53 = vmax.f32 %v1054_v35, 0.0 }
 0x11f   : > { %v1376_v56 = vmax.f32 %v1108_v61, 0.0  ;;  %v1110_v4 = vadd.f32 %v1109_v52, %v2389_v5  ;;  %1570 = vmatprep.subr.bf16.mxu1 %v1483_v50  ;;  %v1056_v5 = vadd.f32 %v2477_v48, %v2331_v43  ;;  %v1478_v50 = vpack.c.bf16 %v1360_v62, %v1358_v36  ;;  %v2939_v36 = vld [vmem:[#allocation3_spill] sm:$0xff] }
 0x120   : > { %v1113_v47 = vpop.f32.mrf.mxu0 }
 0x121   : > { %v2562_v28 = vpack.c.bf16 %v1376_v56, %v1374_v42  ;;  %v1377_v38 = vmax.f32 %v1110_v4, 0.0  ;;  %v1114_v24 = vadd.f32 %v1113_v47, %v2383_v2  ;;  %v1355_v37 = vmax.f32 %v1056_v5, 0.0  ;;  %v2936_v47 = vld [vmem:[#allocation29_spill] sm:$0xff] }
 0x122   : > { %v1115_v14 = vpop.f32.mrf.mxu0  ;;  %1571 = vmatpush1.bf16.msra.mxu1 %v1482_v31  ;;  %v1350_v42 = vmax.f32 %v1044_v8, 0.0 }
 0x123   : > { %v2568_v41 = vpack.c.bf16 %v1377_v38, %v1375_v10  ;;  %1572 = vmatprep.subr.bf16.mxu1 %v1481_v9  ;;  %v1116_v1 = vadd.f32 %v1115_v14, %v2383_v2  ;;  %v1378_v44 = vmax.f32 %v1114_v24, 0.0  ;;  %v1048_v2 = vadd.f32 %v2459_v49, %v2339_v46  ;;  %v2612_v10 = vpop.f32.mrf.mxu1 }
 0x124   : > { %v1117_v16 = vpop.f32.mrf.mxu0  ;;  %v1477_v51 = vpack.c.bf16 %v1357_v32, %v1355_v37  ;;  %v1476_v49 = vpack.c.bf16 %v1356_v58, %v1354_v53 }
 0x125   : > { %v1118_v48 = vadd.f32 %v1117_v16, %v2385_v3  ;;  %v1379_v61 = vmax.f32 %v1116_v1, 0.0  ;;  %v1352_v46 = vmax.f32 %v1048_v2, 0.0  ;;  %v2614_v20 = vpop.f32.mrf.mxu1  ;;  %v2937_v1 = vld [vmem:[#allocation5_spill] sm:$0xff] }
 0x126   : > { %v1119_v19 = vpop.f32.mrf.mxu0  ;;  %1573 = vmatpush1.bf16.msra.mxu1 %v1480_v40 }
 0x127   : > { %v1380_v18 = vmax.f32 %v1118_v48, 0.0  ;;  %v1120_v17 = vadd.f32 %v1119_v19, %v2385_v3  ;;  %1574 = vmatprep.subr.bf16.mxu1 %v1479_v7  ;;  %v1351_v3 = vmax.f32 %v1046_v6, 0.0  ;;  %v1474_v4 = vpack.c.bf16 %v1352_v46, %v1350_v42  ;;  %v2616_v5 = vpop.f32.mrf.mxu1  ;;  %v2938_v6 = vld [vmem:[#allocation2_spill] sm:$0xff] }
 0x128   : > { %v2584_v33 = vpop.f32.mrf.mxu0 }
 0x129   : > { %v2586_v43 = vpack.c.bf16 %v1380_v18, %v1378_v44  ;;  %v1381_v34 = vmax.f32 %v1120_v17, 0.0  ;;  %v1475_v21 = vpack.c.bf16 %v1353_v0, %v1351_v3  ;;  %v2618_v24 = vpop.f32.mrf.mxu1  ;;  %v2940_v17 = vld [vmem:[#allocation4_spill] sm:$0xff] }
 0x12a   : > { %v2590_v27 = vpop.f32.mrf.mxu0  ;;  %1575 = vmatpush1.bf16.msra.mxu1 %v1478_v50 }
 0x12b   : > { %v2592_v39 = vpack.c.bf16 %v1381_v34, %v1379_v61  ;;  %1576 = vmatprep.subr.bf16.mxu1 %v1477_v51  ;;  %v2620_v60 = vpop.f32.mrf.mxu1  ;;  %v2941_v61 = vld [vmem:[#allocation7_spill] sm:$0xff] }
 0x12c   : > { %v2594_v52 = vpop.f32.mrf.mxu0 }
 0x12d   : > { %v2622_v16 = vpop.f32.mrf.mxu1 }
 0x12e   : > { %v2596_v56 = vpop.f32.mrf.mxu0  ;;  %1577 = vmatpush1.bf16.msra.mxu1 %v1476_v49 }
 0x12f   : > { %1578 = vmatprep.subr.bf16.mxu1 %v1475_v21  ;;  %v2627_v37 = vpop.f32.mrf.mxu1 }
 0x130   : > { %v2598_v45 = vpop.f32.mrf.mxu0 }
 0x131   : > { %v2636_v46 = vpop.f32.mrf.mxu1 }
 0x132   : > { %v2600_v30 = vpop.f32.mrf.mxu0  ;;  %1579 = vmatpush1.bf16.msra.mxu1 %v1474_v4  ;;  %v2942_v4 = vld [vmem:[#allocation6_spill] sm:$0xff] }
 0x133   : > { %1580 = vmatprep.subr.bf16.mxu1 %v2455_v12 }
 0x134   : > { %v2603_v11 = vpop.f32.mrf.mxu0 }
 0x136   : > { %v2605_v15 = vpop.f32.mrf.mxu0  ;;  %1581 = vmatpush1.bf16.msra.mxu1 %v2447_v23 }
 0x137   : > { %1582 = vmatprep.subr.bf16.mxu1 %v2427_v57 }
 0x138   : > { %v2609_v25 = vpop.f32.mrf.mxu0 }
 0x13a   : > { %v1145_v31 = vpop.f32.mrf.mxu0  ;;  %1583 = vmatpush1.bf16.msra.mxu1 %v2936_v47 }
 0x13c   : > { %v1147_v9 = vpop.f32.mrf.mxu0 }
 0x13e   : > { %v1149_v38 = vpop.f32.mrf.mxu0 }
 0x140   : > { %v1153_v22 = vpop.f32.mrf.mxu0 }
 0x142   : > { %v1155_v12 = vpop.f32.mrf.mxu0 }
 0x143   : > { %v1156_v47 = vadd.f32 %v1155_v12, %v2942_v4  ;;  %v2944_v12 = vld [vmem:[#allocation8_spill] sm:$0xff] }
 0x144   : > { %v1157_v14 = vpop.f32.mrf.mxu0 }
 0x146   : > { %v1159_v63 = vpop.f32.mrf.mxu0 }
 0x147   : > { %v1160_v34 = vadd.f32 %v1159_v63, %v2941_v61  ;;  %v2943_v63 = vld [vmem:[#allocation9_spill] sm:$0xff] }
 0x148   : > { %v1163_v23 = vpop.f32.mrf.mxu0 }
 0x149   : > { %v1164_v49 = vadd.f32 %v1163_v23, %v2940_v17  ;;  %v1154_v23 = vadd.f32 %v1153_v22, %v2942_v4 }
 0x14a   : > { %v1165_v57 = vpop.f32.mrf.mxu0 }
 0x14b   : > { %v1166_v2 = vadd.f32 %v1165_v57, %v2940_v17 }
 0x14c   : > { %v1167_v26 = vpop.f32.mrf.mxu0 }
 0x14d   : > { %v1168_v58 = vadd.f32 %v1167_v26, %v2937_v1  ;;  %v1399_v57 = vmax.f32 %v1166_v2, 0.0  ;;  %v1158_v26 = vadd.f32 %v1157_v14, %v2941_v61  ;;  %v1395_v14 = vmax.f32 %v1156_v47, 0.0  ;;  %v2947_v47 = vld [vmem:[#allocation13_spill] sm:$0xff] }
 0x14e   : > { %v1169_v62 = vpop.f32.mrf.mxu0 }
 0x14f   : > { %v1170_v48 = vadd.f32 %v1169_v62, %v2937_v1  ;;  %v1150_v1 = vadd.f32 %v1149_v38, %v2943_v63  ;;  %v1396_v17 = vmax.f32 %v1158_v26, 0.0 }
 0x150   : > { %v1173_v40 = vpop.f32.mrf.mxu0 }
 0x151   : > { %v1174_v44 = vadd.f32 %v1173_v40, %v2938_v6  ;;  %v1401_v8 = vmax.f32 %v1170_v48, 0.0  ;;  %v1400_v40 = vmax.f32 %v1168_v58, 0.0  ;;  %v1397_v48 = vmax.f32 %v1160_v34, 0.0 }
 0x152   : > { %v1175_v32 = vpop.f32.mrf.mxu0  ;;  %v1144_v34 = vadd.f32 %v2609_v25, %v2944_v12 }
 0x153   : > { %v1176_v35 = vadd.f32 %v1175_v32, %v2938_v6  ;;  %v1402_v21 = vmax.f32 %v1174_v44, 0.0  ;;  %v1499_v6 = vpack.c.bf16 %v1401_v8, %v1399_v57  ;;  %v1146_v44 = vadd.f32 %v1145_v31, %v2944_v12 }
 0x154   : > { %v1177_v7 = vpop.f32.mrf.mxu0  ;;  %v1497_v61 = vpack.c.bf16 %v1397_v48, %v1395_v14  ;;  %v1394_v8 = vmax.f32 %v1154_v23, 0.0  ;;  %v1130_v57 = vadd.f32 %v2596_v56, %v2947_v47  ;;  %v1128_v48 = vadd.f32 %v2594_v52, %v2947_v47 }
 0x155   : > { %v1178_v19 = vadd.f32 %v1177_v7, %v2939_v36  ;;  %v1403_v53 = vmax.f32 %v1176_v35, 0.0  ;;  %v2646_v35 = vpop.f32.mrf.mxu1 }
 0x156   : > { %v1179_v18 = vpop.f32.mrf.mxu0 }
 0x157   : > { %v1180_v0 = vadd.f32 %v1179_v18, %v2939_v36  ;;  %v1404_v50 = vmax.f32 %v1178_v19, 0.0  ;;  %v1398_v36 = vmax.f32 %v1164_v49, 0.0  ;;  %v1148_v18 = vadd.f32 %v1147_v9, %v2943_v63  ;;  %v2657_v22 = vpop.f32.mrf.mxu1  ;;  %v2948_v63 = vld [vmem:[#allocation12_spill] sm:$0xff] }
 0x158   : > { %v2633_v51 = vpop.f32.mrf.mxu0 }
 0x159   : > { %v1405_v3 = vmax.f32 %v1180_v0, 0.0  ;;  %v1500_v32 = vpack.c.bf16 %v1404_v50, %v1402_v21  ;;  %v1498_v2 = vpack.c.bf16 %v1400_v40, %v1398_v36  ;;  %v2945_v0 = vld [vmem:[#allocation11_spill] sm:$0xff]  ;;  %v1393_v50 = vmax.f32 %v1150_v1, 0.0  ;;  %v2671_v26 = vpop.f32.mrf.mxu1 }
 0x15a   : > { %v2639_v42 = vpop.f32.mrf.mxu0  ;;  %v1140_v58 = vadd.f32 %v2605_v15, %v2945_v0  ;;  %v1138_v49 = vadd.f32 %v2603_v11, %v2945_v0  ;;  %v1392_v15 = vmax.f32 %v1148_v18, 0.0  ;;  %v1496_v21 = vpack.c.bf16 %v1396_v17, %v1394_v8  ;;  %v2949_v8 = vld [vmem:[#allocation14_spill] sm:$0xff] }
 0x15b   : > { %v1501_v62 = vpack.c.bf16 %v1405_v3, %v1403_v53  ;;  %v2946_v53 = vld [vmem:[#allocation10_spill] sm:$0xff]  ;;  %v1391_v3 = vmax.f32 %v1146_v44, 0.0  ;;  %v1126_v11 = vadd.f32 %v2590_v27, %v2948_v63  ;;  %v1385_v36 = vmax.f32 %v1130_v57, 0.0  ;;  %v2683_v44 = vpop.f32.mrf.mxu1  ;;  %v2953_v57 = vld [vmem:[#allocation37_spill] sm:$0xff] }
 0x15c   : > { %v2643_v7 = vpop.f32.mrf.mxu0  ;;  %v1136_v9 = vadd.f32 %v2600_v30, %v2946_v53  ;;  %v1389_v25 = vmax.f32 %v1140_v58, 0.0  ;;  %v1134_v40 = vadd.f32 %v2598_v45, %v2946_v53  ;;  %v1390_v30 = vmax.f32 %v1144_v34, 0.0  ;;  %v2950_v53 = vld [vmem:[#allocation39_spill] sm:$0xff] }
 0x15d   : > { %1584 = vmatprep.subr.bf16.mxu1 %v1501_v62  ;;  %v1495_v62 = vpack.c.bf16 %v1393_v50, %v1391_v3  ;;  %v1388_v56 = vmax.f32 %v1138_v49, 0.0  ;;  %v1124_v45 = vadd.f32 %v2584_v33, %v2948_v63  ;;  %v1383_v27 = vmax.f32 %v1126_v11, 0.0  ;;  %v2691_v58 = vpop.f32.mrf.mxu1  ;;  %v2951_v3 = vld [vmem:[#allocation15_spill] sm:$0xff]  ;;  %v2955_v63 = vld [vmem:[#allocation16_spill] sm:$0xff] }
 0x15e   : > { %v2649_v19 = vpop.f32.mrf.mxu0  ;;  %1585 = vmatpush2.bf16.msra.mxu1 %v1500_v32  ;;  %v1387_v1 = vmax.f32 %v1136_v9, 0.0  ;;  %v1386_v14 = vmax.f32 %v1134_v40, 0.0  ;;  %v1384_v17 = vmax.f32 %v1128_v48, 0.0  ;;  %v1256_v9 = vadd.f32 %v2950_v53, %v2949_v8  ;;  %v2952_v49 = vld [vmem:[#allocation43_spill] sm:$0xff] }
 0x15f   : > { %1586 = vmatprep.subr.bf16.mxu1 %v1499_v6  ;;  %v1494_v6 = vpack.c.bf16 %v1392_v15, %v1390_v30  ;;  %v1491_v0 = vpack.c.bf16 %v1385_v36, %v1383_v27  ;;  %v1382_v50 = vmax.f32 %v1124_v45, 0.0  ;;  %v1260_v15 = vadd.f32 %v2952_v49, %v2951_v3  ;;  %v2956_v11 = vld [vmem:[#allocation31_spill] sm:$0xff]  ;;  %v2960_v27 = vld [vmem:[#allocation22_spill] sm:$0xff] }
 0x160   : > { %v2653_v38 = vpop.f32.mrf.mxu0  ;;  %v1493_v12 = vpack.c.bf16 %v1389_v25, %v1387_v1  ;;  %v1254_v25 = vadd.f32 %v2953_v57, %v2949_v8  ;;  %v1246_v1 = vadd.f32 %v2956_v11, %v2955_v63  ;;  %v1435_v48 = vmax.f32 %v1256_v9, 0.0  ;;  %v2962_v8 = vld [vmem:[#allocation33_spill] sm:$0xff]  ;;  %v2963_v57 = vld [vmem:[#allocation19_spill] sm:$0xff] }
 0x161   : > { %v1490_v34 = vpack.c.bf16 %v1384_v17, %v1382_v50 }
 0x162   : > { %v2661_v31 = vpop.f32.mrf.mxu0  ;;  %1587 = vmatpush2.bf16.msra.mxu1 %v1498_v2  ;;  %v1492_v2 = vpack.c.bf16 %v1388_v56, %v1386_v14  ;;  %v2957_v56 = vld [vmem:[#allocation17_spill] sm:$0xff] }
 0x163   : > { %1588 = vmatprep.subr.bf16.mxu1 %v1497_v61  ;;  %v1248_v53 = vadd.f32 %v2962_v8, %v2957_v56 }
 0x164   : > { %v2667_v4 = vpop.f32.mrf.mxu0 }
 0x166   : > { %v2675_v32 = vpop.f32.mrf.mxu0  ;;  %1589 = vmatpush2.bf16.msra.mxu1 %v1496_v21  ;;  %v2701_v21 = vpop.f32.mrf.mxu1 }
 0x167   : > { %1590 = vmatprep.subr.bf16.mxu1 %v1495_v62  ;;  %v2954_v62 = vld [vmem:[#allocation41_spill] sm:$0xff] }
 0x168   : > { %v2681_v23 = vpop.f32.mrf.mxu0  ;;  %v1258_v40 = vadd.f32 %v2954_v62, %v2951_v3  ;;  %v2712_v45 = vpop.f32.mrf.mxu1  ;;  %v1431_v3 = vmax.f32 %v1246_v1, 0.0  ;;  %v2964_v62 = vld [vmem:[#allocation26_spill] sm:$0xff]  ;;  %v1432_v1 = vmax.f32 %v1248_v53, 0.0 }
 0x16a   : > { %v2687_v18 = vpop.f32.mrf.mxu0  ;;  %1591 = vmatpush2.bf16.msra.mxu1 %v1494_v6  ;;  %v2958_v6 = vld [vmem:[#allocation35_spill] sm:$0xff]  ;;  %v2724_v11 = vpop.f32.mrf.mxu1 }
 0x16b   : > { %1592 = vmatprep.subr.bf16.mxu1 %v1493_v12  ;;  %v1250_v36 = vadd.f32 %v2958_v6, %v2957_v56  ;;  %v1437_v12 = vmax.f32 %v1260_v15, 0.0 }
 0x16c   : > { %v2689_v52 = vpop.f32.mrf.mxu0 }
 0x16d   : > { %v1433_v49 = vmax.f32 %v1250_v36, 0.0  ;;  %v1517_v15 = vpack.c.bf16 %v1437_v12, %v1435_v48  ;;  %v2967_v48 = vld [vmem:[#allocation24_spill] sm:$0xff] }
 0x16e   : > { %v2693_v61 = vpop.f32.mrf.mxu0  ;;  %1593 = vmatpush2.bf16.msra.mxu1 %v1492_v2  ;;  %v1434_v2 = vmax.f32 %v1254_v25, 0.0  ;;  %v1238_v36 = vadd.f32 %v2967_v48, %v2963_v57 }
 0x16f   : > { %1594 = vmatprep.subr.bf16.mxu1 %v1491_v0  ;;  %v2961_v0 = vld [vmem:[#allocation28_spill] sm:$0xff]  ;;  %v1515_v13 = vpack.c.bf16 %v1433_v49, %v1431_v3 }
 0x170   : > { %v2695_v33 = vpop.f32.mrf.mxu0  ;;  %v1244_v50 = vadd.f32 %v2961_v0, %v2955_v63  ;;  %v1428_v53 = vmax.f32 %v1238_v36, 0.0 }
 0x172   : > { %v1215_v47 = vpop.f32.mrf.mxu0  ;;  %1595 = vmatpush2.bf16.msra.mxu1 %v1490_v34  ;;  %v1436_v34 = vmax.f32 %v1258_v40, 0.0  ;;  %v2966_v40 = vld [vmem:[#allocation20_spill] sm:$0xff]  ;;  %v1430_v56 = vmax.f32 %v1244_v50, 0.0 }
 0x173   : > { %1596 = vmatprep.subr.bf16.mxu1 %v2592_v39  ;;  %v2959_v39 = vld [vmem:[#allocation18_spill] sm:$0xff] }
 0x174   : > { %v1217_v30 = vpop.f32.mrf.mxu0  ;;  %v1236_v17 = vadd.f32 %v2960_v27, %v2959_v39  ;;  %v1234_v63 = vadd.f32 %v2966_v40, %v2959_v39  ;;  %v1516_v27 = vpack.c.bf16 %v1436_v34, %v1434_v2  ;;  %v1514_v2 = vpack.c.bf16 %v1432_v1, %v1430_v56 }
 0x176   : > { %v1219_v14 = vpop.f32.mrf.mxu0  ;;  %1597 = vmatpush2.bf16.msra.mxu1 %v2586_v43  ;;  %v1240_v43 = vadd.f32 %v2964_v62, %v2963_v57  ;;  %v1427_v0 = vmax.f32 %v1236_v17, 0.0  ;;  %v2968_v62 = vld [vmem:[#allocation51_spill] sm:$0xff]  ;;  %v1426_v34 = vmax.f32 %v1234_v63, 0.0  ;;  %v2973_v63 = vld [vmem:[#allocation32_spill] sm:$0xff] }
 0x177   : > { %1598 = vmatprep.subr.bf16.mxu1 %v2568_v41  ;;  %v2965_v41 = vld [vmem:[#allocation52_spill] sm:$0xff]  ;;  %v2971_v17 = vld [vmem:[#allocation27_spill] sm:$0xff]  ;;  %v1210_v56 = vadd.f32 %v2693_v61, %v2973_v63 }
 0x178   : > { %v1223_v9 = vpop.f32.mrf.mxu0  ;;  %v1563_v25 = vcombine.high %v2965_v41, %v2965_v41  ;;  %v1429_v8 = vmax.f32 %v1240_v43, 0.0  ;;  %v2969_v41 = vld [vmem:[#allocation21_spill] sm:$0xff]  ;;  %v1220_v43 = vadd.f32 %v1219_v14, %v2971_v17 }
 0x179   : > { %v1224_v49 = vadd.f32 %v1223_v9, %v2969_v41  ;;  %v2974_v9 = vld [vmem:[#allocation30_spill] sm:$0xff] }
 0x17a   : > { %v1225_v6 = vpop.f32.mrf.mxu0  ;;  %1599 = vmatpush2.bf16.msra.mxu1 %v2562_v28  ;;  %v2734_v28 = vpop.f32.mrf.mxu1  ;;  %v1513_v48 = vpack.c.bf16 %v1429_v8, %v1427_v0  ;;  %v1421_v1 = vmax.f32 %v1220_v43, 0.0 }
 0x17b   : > { %1609 = vmatprep.subr.bf16.mxu1 %v1517_v15  ;;  %v1226_v39 = vadd.f32 %v1225_v6, %v2969_v41  ;;  %v2970_v15 = vld [vmem:[#allocation23_spill] sm:$0xff]  ;;  %v1512_v6 = vpack.c.bf16 %v1428_v53, %v1426_v34  ;;  %v1422_v0 = vmax.f32 %v1224_v49, 0.0  ;;  %v2976_v53 = vld [vmem:[#allocation34_spill] sm:$0xff] }
 0x17c   : > { %v1227_v12 = vpop.f32.mrf.mxu0  ;;  %v1333_v3 = vpop.f32.mrf.mxu1 }
 0x17d   : > { %1601 = vmatmul.mubr.bf16.vlgmr.msra.gmra.mxu1 %v2968_v62  ;;  %v1228_v57 = vadd.f32 %v1227_v12, %v2970_v15  ;;  %v1423_v62 = vmax.f32 %v1226_v39, 0.0 }
 0x17e   : > { %v1229_v55 = vpop.f32.mrf.mxu0  ;;  %1610 = vmatpush1.bf16.msra.mxu1 %v1516_v27  ;;  %1641 = vmatprep.mubr.bf16.mxu1 %v1563_v25  ;;  %v2972_v27 = vld [vmem:[#allocation25_spill] sm:$0xff]  ;;  %v1335_v14 = vpop.f32.mrf.mxu1 }
 0x17f   : > { %v1230_v50 = vadd.f32 %v1229_v55, %v2970_v15  ;;  %1611 = vmatprep.subr.bf16.mxu1 %v1515_v13  ;;  %v1216_v25 = vadd.f32 %v1215_v47, %v2972_v27  ;;  %v1218_v13 = vadd.f32 %v1217_v30, %v2971_v17  ;;  %v1424_v55 = vmax.f32 %v1228_v57, 0.0  ;;  %v2975_v15 = vld [vmem:[#allocation36_spill] sm:$0xff] }
 0x180   : > { %v1214_v12 = vadd.f32 %v2695_v33, %v2972_v27  ;;  %v1206_v47 = vadd.f32 %v2687_v18, %v2974_v9  ;;  %v1208_v30 = vadd.f32 %v2689_v52, %v2973_v63  ;;  %v1200_v61 = vadd.f32 %v2675_v32, %v2975_v15 }
 0x181   : > { %v1425_v40 = vmax.f32 %v1230_v50, 0.0  ;;  %v1419_v8 = vmax.f32 %v1216_v25, 0.0  ;;  %v1420_v41 = vmax.f32 %v1218_v13, 0.0  ;;  %v1510_v39 = vpack.c.bf16 %v1424_v55, %v1422_v0 }
 0x182   : > { %1612 = vmatpush1.bf16.msra.mxu1 %v1514_v2  ;;  %v1337_v2 = vpop.f32.mrf.mxu1  ;;  %v1204_v33 = vadd.f32 %v2681_v23, %v2974_v9  ;;  %v1418_v34 = vmax.f32 %v1214_v12, 0.0  ;;  %v1196_v18 = vadd.f32 %v2661_v31, %v2976_v53  ;;  %v1415_v57 = vmax.f32 %v1206_v47, 0.0  ;;  %v2981_v47 = vld [vmem:[#allocation45_spill] sm:$0xff] }
 0x183   : > { %1613 = vmatprep.subr.bf16.mxu1 %v1513_v48  ;;  %v1511_v36 = vpack.c.bf16 %v1425_v40, %v1423_v62  ;;  %v1417_v62 = vmax.f32 %v1210_v56, 0.0  ;;  %v1509_v50 = vpack.c.bf16 %v1421_v1, %v1419_v8  ;;  %v1198_v52 = vadd.f32 %v2667_v4, %v2975_v15  ;;  %v2977_v40 = vld [vmem:[#allocation40_spill] sm:$0xff]  ;;  %v2979_v56 = vld [vmem:[#allocation42_spill] sm:$0xff] }
 0x184   : > { %v1416_v17 = vmax.f32 %v1208_v30, 0.0  ;;  %v1508_v43 = vpack.c.bf16 %v1420_v41, %v1418_v34  ;;  %v1190_v32 = vadd.f32 %v2649_v19, %v2977_v40  ;;  %v1413_v48 = vmax.f32 %v1200_v61, 0.0  ;;  %v1339_v27 = vpop.f32.mrf.mxu1  ;;  %v2980_v1 = vld [vmem:[#allocation44_spill] sm:$0xff] }
 0x185   : > { %v1507_v49 = vpack.c.bf16 %v1417_v62, %v1415_v57  ;;  %v1194_v23 = vadd.f32 %v2653_v38, %v2976_v53  ;;  %v1414_v25 = vmax.f32 %v1204_v33, 0.0  ;;  %v1411_v13 = vmax.f32 %v1196_v18, 0.0  ;;  %v2983_v33 = vld [vmem:[#allocation47_spill] sm:$0xff]  ;;  %v2984_v57 = vld [vmem:[#allocation48_spill] sm:$0xff] }
 0x186   : > { %1614 = vmatpush1.bf16.msra.mxu1 %v1512_v6  ;;  %v2978_v6 = vld [vmem:[#allocation38_spill] sm:$0xff]  ;;  %v1188_v4 = vadd.f32 %v2643_v7, %v2977_v40  ;;  %v1412_v55 = vmax.f32 %v1198_v52, 0.0  ;;  %v1336_v19 = vadd.f32 %v1335_v14, %v2979_v56  ;;  %v1409_v12 = vmax.f32 %v1190_v32, 0.0  ;;  %v2985_v40 = vld [vmem:[#allocation49_spill] sm:$0xff] }
 0x187   : > { %1615 = vmatprep.subr.bf16.mxu1 %v1511_v36  ;;  %v1186_v31 = vadd.f32 %v2639_v42, %v2978_v6  ;;  %v1506_v63 = vpack.c.bf16 %v1416_v17, %v1414_v25  ;;  %v1340_v36 = vadd.f32 %v1339_v27, %v2980_v1  ;;  %v1505_v0 = vpack.c.bf16 %v1413_v48, %v1411_v13  ;;  %v2986_v27 = vld [vmem:[#allocation50_spill] sm:$0xff] }
 0x188   : > { %v1184_v38 = vadd.f32 %v2633_v51, %v2978_v6  ;;  %v1410_v9 = vmax.f32 %v1194_v23, 0.0  ;;  %v1326_v42 = vadd.f32 %v2712_v45, %v2981_v47  ;;  %v1334_v7 = vadd.f32 %v1333_v3, %v2979_v56 }
 0x189   : > { %v1407_v8 = vmax.f32 %v1186_v31, 0.0  ;;  %v1338_v30 = vadd.f32 %v1337_v2, %v2980_v1  ;;  %v1408_v41 = vmax.f32 %v1188_v4, 0.0  ;;  %v1467_v61 = vmax.f32 %v1336_v19, 0.0  ;;  %v2987_v31 = vld [vmem:[#allocation53_spill] sm:$0xff] }
 0x18a   : > { %1616 = vmatpush1.bf16.msra.mxu1 %v1510_v39  ;;  %v1504_v14 = vpack.c.bf16 %v1412_v55, %v1410_v9  ;;  %v2982_v39 = vld [vmem:[#allocation46_spill] sm:$0xff]  ;;  %v1469_v62 = vmax.f32 %v1340_v36, 0.0  ;;  %v1406_v51 = vmax.f32 %v1184_v38, 0.0  ;;  %v1316_v34 = vadd.f32 %v2671_v26, %v2983_v33  ;;  %v2989_v36 = vld [vmem:[#allocation55_spill] sm:$0xff] }
 0x18b   : > { %1617 = vmatprep.subr.bf16.mxu1 %v1509_v50  ;;  %v1330_v15 = vadd.f32 %v2734_v28, %v2982_v39  ;;  %v1503_v50 = vpack.c.bf16 %v1409_v12, %v1407_v8  ;;  %v1324_v45 = vadd.f32 %v2701_v21, %v2981_v47  ;;  %v1328_v3 = vadd.f32 %v2724_v11, %v2982_v39  ;;  %v2990_v12 = vld [vmem:[#allocation56_spill] sm:$0xff] }
 0x18c   : > { %v1466_v2 = vmax.f32 %v1334_v7, 0.0  ;;  %v1468_v53 = vmax.f32 %v1338_v30, 0.0  ;;  %v1502_v18 = vpack.c.bf16 %v1408_v41, %v1406_v51  ;;  %v1320_v28 = vadd.f32 %v2691_v58, %v2984_v57  ;;  %v2991_v7 = vld [vmem:[#allocation57_spill] sm:$0xff]  ;;  %v2994_v51 = vld [vmem:[#allocation58_spill] sm:$0xff] }
 0x18d   : > { %v1463_v52 = vmax.f32 %v1326_v42, 0.0  ;;  %v1465_v17 = vmax.f32 %v1330_v15, 0.0  ;;  %v1306_v26 = vadd.f32 %v2627_v37, %v2985_v40  ;;  %v1314_v21 = vadd.f32 %v2657_v22, %v2983_v33 }
 0x18e   : > { %1618 = vmatpush1.bf16.msra.mxu1 %v1508_v43  ;;  %v1533_v43 = vpack.c.bf16 %v1469_v62, %v1467_v61  ;;  %v1318_v11 = vadd.f32 %v2683_v44, %v2984_v57  ;;  %v1462_v32 = vmax.f32 %v1324_v45, 0.0  ;;  %v1464_v48 = vmax.f32 %v1328_v3, 0.0 }
 0x18f   : > { %1619 = vmatprep.subr.bf16.mxu1 %v1507_v49  ;;  %v1532_v49 = vpack.c.bf16 %v1468_v53, %v1466_v2  ;;  %v1310_v58 = vadd.f32 %v2646_v35, %v2986_v27  ;;  %v1459_v23 = vmax.f32 %v1316_v34, 0.0  ;;  %v1461_v25 = vmax.f32 %v1320_v28, 0.0  ;;  %v2988_v35 = vld [vmem:[#allocation54_spill] sm:$0xff]  ;;  %v1537_v2 = vpop.permute.xlu0 %1536 }
 0x190   : > { %v1531_v6 = vpack.c.bf16 %v1465_v17, %v1463_v52  ;;  %v1304_v37 = vadd.f32 %v2622_v16, %v2985_v40  ;;  %v1296_v22 = vadd.f32 %v2616_v5, %v2987_v31  ;;  %v1308_v44 = vadd.f32 %v2636_v46, %v2986_v27 }
 0x191   : > { %v1458_v13 = vmax.f32 %v1314_v21, 0.0  ;;  %v1460_v4 = vmax.f32 %v1318_v11, 0.0  ;;  %v1530_v55 = vpack.c.bf16 %v1464_v48, %v1462_v32  ;;  %v1457_v56 = vmax.f32 %v1310_v58, 0.0 }
 0x192   : > { %1620 = vmatpush1.bf16.msra.mxu1 %v1506_v63  ;;  %v1455_v63 = vmax.f32 %v1306_v26, 0.0  ;;  %v1300_v19 = vadd.f32 %v2620_v60, %v2988_v35  ;;  %v1529_v1 = vpack.c.bf16 %v1461_v25, %v1459_v23  ;;  %v1294_v16 = vadd.f32 %v2614_v20, %v2987_v31 }
 0x193   : > { %1621 = vmatprep.subr.bf16.mxu1 %v1505_v0  ;;  %v1286_v5 = vadd.f32 %v2990_v12, %v2989_v36  ;;  %v1454_v0 = vmax.f32 %v1304_v37, 0.0  ;;  %v1456_v38 = vmax.f32 %v1308_v44, 0.0  ;;  %v1298_v46 = vadd.f32 %v2618_v24, %v2988_v35  ;;  %v2993_v24 = vld [vmem:[#allocation51_spill] sm:$0xff] }
 0x194   : > { %v1528_v9 = vpack.c.bf16 %v1460_v4, %v1458_v13  ;;  %v1451_v47 = vmax.f32 %v1296_v22, 0.0  ;;  %v1527_v42 = vpack.c.bf16 %v1457_v56, %v1455_v63  ;;  %v1453_v8 = vmax.f32 %v1300_v19, 0.0 }
 0x195   : > { %v1290_v60 = vadd.f32 %v2612_v10, %v2991_v7  ;;  %v1526_v30 = vpack.c.bf16 %v1456_v38, %v1454_v0  ;;  %v1450_v20 = vmax.f32 %v1294_v16, 0.0  ;;  %v1452_v41 = vmax.f32 %v1298_v46, 0.0  ;;  %v2992_v10 = vld [vmem:[#allocation59_spill] sm:$0xff] }
 0x196   : > { %1622 = vmatpush1.bf16.msra.mxu1 %v1504_v14  ;;  %v1447_v14 = vmax.f32 %v1286_v5, 0.0  ;;  %v1525_v15 = vpack.c.bf16 %v1453_v8, %v1451_v47 }
 0x197   : > { %1623 = vmatprep.subr.bf16.mxu1 %v1503_v50  ;;  %v1449_v39 = vmax.f32 %v1290_v60, 0.0  ;;  %v1524_v61 = vpack.c.bf16 %v1452_v41, %v1450_v20  ;;  %v1562_v50 = vcombine.high %v2993_v24, %v2993_v24 }
 0x199   : > { %v1523_v62 = vpack.c.bf16 %v1449_v39, %v1447_v14 }
 0x19a   : > { %1624 = vmatpush1.bf16.msra.mxu1 %v1502_v18 }
 0x19b   : > { %1625 = vmatprep.subr.bf16.mxu1 %v1533_v43 }
 0x19e   : > { %1626 = vmatpush2.bf16.msra.mxu1 %v1532_v49 }
 0x19f   : > { %1627 = vmatprep.subr.bf16.mxu1 %v1531_v6 }
 0x1a2   : > { %1628 = vmatpush2.bf16.msra.mxu1 %v1530_v55 }
 0x1a3   : > { %1629 = vmatprep.subr.bf16.mxu1 %v1529_v1 }
 0x1a6   : > { %1630 = vmatpush2.bf16.msra.mxu1 %v1528_v9 }
 0x1a7   : > { %1631 = vmatprep.subr.bf16.mxu1 %v1527_v42 }
 0x1aa   : > { %1632 = vmatpush2.bf16.msra.mxu1 %v1526_v30 }
 0x1ab   : > { %1633 = vmatprep.subr.bf16.mxu1 %v1525_v15 }
 0x1ae   : > { %1634 = vmatpush2.bf16.msra.mxu1 %v1524_v61 }
 0x1af   : > { %1635 = vmatprep.subr.bf16.mxu1 %v1523_v62 }
 0x1b2   : > { %1636 = vmatpush2.bf16.msra.mxu1 %v2525_v54 }
 0x1b3   : > { %1637 = vmatprep.subr.bf16.mxu1 %v2531_v59 }
 0x1b6   : > { %1638 = vmatpush2.bf16.msra.mxu1 %v2527_v29 }
 0x1b7   : > { %1639 = vmatprep.subr.bf16.mxu1 %v2992_v10 }
 0x1ba   : > { %1640 = vmatpush2.bf16.msra.mxu1 %v2994_v51 }
 0x1bd   : > { %1642 = vmatmul.mubr.bf16.vlgmr.msra.gmra.mxu1 %v1562_v50 }
 0x23d   : > { %v1602_v33 = vpop.f32.mrf.mxu1 }
 0x23e   : > { %v1603_v54 = vadd.f32 %v1602_v33, %v1537_v2 }
 0x23f   : > { %v1604_v34 = vpop.f32.mrf.mxu1 }
 0x240   : > { %v1605_v18 = vadd.f32 %v1604_v34, %v1537_v2 }
 0x241   : > { %v1606_v45 = vpop.f32.mrf.mxu1 }
 0x243   : > { %v1607_v3 = vpop.f32.mrf.mxu1 }
 0x27d   : > { %v1643_v53 = vpop.f32.mrf.mxu1 }
 0x27e   : > { %v1644_v57 = vadd.f32 %v1643_v53, %v1603_v54 }
 0x27f   : > { %v1645_v59 = vpop.f32.mrf.mxu1 }
 0x280   : > { %v1646_v29 = vadd.f32 %v1645_v59, %v1605_v18 }
 0x281   : > { %v1647_v28 = vpop.f32.mrf.mxu1 }
 0x282   : > { %v1652_v52 = vcombine.low %v1644_v57, %v1646_v29 }
 0x283   : > { %v1648_v17 = vpop.f32.mrf.mxu1 }
 0x284   : > { %1825 = vst.sshfl [vmem:[%s262_s24] sm:$0x33 pattern:$0x76325410] %v1652_v52 }
 0x285 PF: > { %s15_s20 = sadd.s32 1, %s1914_s20   ;;  %s2995_s18 = smov %s1910_s19 }
 0x286   : > { %p12_p5 = scmp.ge.s32.totalorder %s15_s20, 4   ;;  %s2996_s19 = smov %s2998_s21 }
 0x288   :  { %14 = sbr.rel (!%p12_p5) target bundleno = 2 (0x2), region = 70 }

</bundles_post_ra>
